<compile_context>
chip_gen: v5e
topology: v5e:2x2
jax: 0.10.0
libtpu: 0.0.40
codegen_flags: <defaults>
</compile_context>

<pallas_src>
import functools
import math

import jax
import jax.numpy as jnp
from jax.experimental import pallas as pl
from jax.experimental.pallas import tpu as pltpu


# ----------------------------------------------------------------------------
# Per-chip knobs
# ----------------------------------------------------------------------------
def _vmem_limit_bytes():
    try:
        cap = int(pltpu.get_tpu_info().vmem_capacity_bytes)
        return min(cap * 3 // 4, 96 * 1024 * 1024)
    except Exception:
        return 48 * 1024 * 1024


_VMEM_LIMIT = _vmem_limit_bytes()


def _default_exp_dtype():
    # bf16 exp uses the bf16 EUP on v6e/v7x (the single EUP slot saturates on
    # f32 exp at small dim_inner); v5e has no bf16 EUP/VPU, so keep f32 there.
    try:
        ver = str(getattr(pltpu.get_tpu_info(), "chip_version", "")).lower()
        if "5" in ver:
            return jnp.float32
    except Exception:
        pass
    return jnp.bfloat16


def _round_up(x, m):
    return (x + m - 1) // m * m


def _pick_tile(n, max_tile):
    """Largest 128-multiple tile <= max_tile dividing n, else full n.

    The full-n fallback is only used by the linear-cost conv kernels; the
    attention kernel pads N instead (see _attn_tiles)."""
    if n <= max_tile:
        return n
    t = max_tile - (max_tile % 128)
    while t >= 128:
        if n % t == 0:
            return t
        t -= 128
    return n


def _attn_tiles(n, q_tile=256, k_tile=256):
    """Pick (n_pad, tq, tk) such that tq | n_pad and tk | n_pad, never full-N."""
    tq = max(128, (q_tile // 128) * 128)
    tk = max(128, (k_tile // 128) * 128)
    n_pad = _round_up(n, math.lcm(tq, tk))
    # Avoid gross over-padding of small inputs.
    while (tq > 128 or tk > 128) and (n_pad - n) * 2 > max(n, 256):
        tq = max(128, (tq // 2 // 128) * 128)
        tk = max(128, (tk // 2 // 128) * 128)
        n_pad = _round_up(n, math.lcm(tq, tk))
    return n_pad, tq, tk


def _attn_vmem_bytes(ci, c_in, c_out, n_pad, tq, tk, kv_resident):
    """Rough per-core VMEM estimate for the attention kernel (double-buffered
    pipeline blocks + scratch + in-kernel temporaries)."""
    kv = n_pad if kv_resident else tk
    blocks = 2 * (3 * ci * tq * 2          # theta tiles (bf16)
                  + 2 * ci * kv * 2        # phi + g blocks (bf16)
                  + c_out * ci * 4         # out_w
                  + c_out * 128 * 4        # out_b (lane padded)
                  + c_in * tq * 4          # residual x tile
                  + c_out * tq * 4)        # output tile
    scratch = ci * tq * 2 + 2 * tq * 128 * 4 + tq * ci * 4
    temps = tq * tk * 12                   # s (f32) + e + intermediates
    return blocks + scratch + temps


# ----------------------------------------------------------------------------
# Fused theta1 / phi / g projection:
#   y = [W_theta1; W_phi; W_g] @ x_tile + b   (one matmul, one x read)
#   outputs are split by channel slab and stored as bf16.
# ----------------------------------------------------------------------------
def _proj3_kernel(w_ref, b_ref, x_ref, t1_ref, phi_ref, g_ref, *, ci):
    y = jnp.dot(w_ref[...], x_ref[0],
                preferred_element_type=jnp.float32) + b_ref[...]   # (3Ci, TN)
    t1_ref[0] = y[0:ci, :].astype(t1_ref.dtype)
    phi_ref[0] = y[ci:2 * ci, :].astype(phi_ref.dtype)
    g_ref[0] = y[2 * ci:3 * ci, :].astype(g_ref.dtype)


def fused_projection(x_flat, w_t1, b_t1, w_phi, b_phi, w_g, b_g,
                     tile_n=1024, out_dtype=jnp.bfloat16):
    B, C_in, N = x_flat.shape
    ci = w_t1.shape[0]
    w = jnp.concatenate([w_t1, w_phi, w_g], axis=0)                 # (3Ci, C_in)
    bb = jnp.concatenate([b_t1, b_phi, b_g], axis=0).reshape(3 * ci, 1)
    tn = _pick_tile(N, tile_n)
    kernel = functools.partial(_proj3_kernel, ci=ci)
    return pl.pallas_call(
        kernel,
        out_shape=(
            jax.ShapeDtypeStruct((B, ci, N), out_dtype),            # theta1
            jax.ShapeDtypeStruct((B, ci, N), out_dtype),            # phi
            jax.ShapeDtypeStruct((B, ci, N), out_dtype),            # g
        ),
        grid=(B, N // tn),
        in_specs=[
            pl.BlockSpec((3 * ci, C_in), lambda b, n: (0, 0)),      # resident
            pl.BlockSpec((3 * ci, 1), lambda b, n: (0, 0)),         # resident
            pl.BlockSpec((1, C_in, tn), lambda b, n: (b, 0, n)),
        ],
        out_specs=(
            pl.BlockSpec((1, ci, tn), lambda b, n: (b, 0, n)),
            pl.BlockSpec((1, ci, tn), lambda b, n: (b, 0, n)),
            pl.BlockSpec((1, ci, tn), lambda b, n: (b, 0, n)),
        ),
        compiler_params=pltpu.CompilerParams(
            dimension_semantics=("parallel", "parallel"),
            vmem_limit_bytes=_VMEM_LIMIT),
    )(w, bb, x_flat)


# ----------------------------------------------------------------------------
# Plain tiled 1x1 conv (stride-2 / stride-4 theta branches):
#   y[b, :, n_tile] = W @ x[b, :, n_tile] + bias
# ----------------------------------------------------------------------------
def _conv1x1_kernel(w_ref, b_ref, x_ref, y_ref):
    y = jnp.dot(w_ref[...], x_ref[0],
                preferred_element_type=jnp.float32) + b_ref[...]
    y_ref[0] = y.astype(y_ref.dtype)


def conv1x1(x_flat, w, b, out_dtype=None, tile_n=1024):
    B, C_in, N = x_flat.shape
    C_out = w.shape[0]
    out_dtype = out_dtype or x_flat.dtype
    tn = _pick_tile(N, tile_n)
    b2 = b.reshape(C_out, 1)
    return pl.pallas_call(
        _conv1x1_kernel,
        out_shape=jax.ShapeDtypeStruct((B, C_out, N), out_dtype),
        grid=(B, N // tn),
        in_specs=[
            pl.BlockSpec((C_out, C_in), lambda i, n: (0, 0)),       # resident
            pl.BlockSpec((C_out, 1), lambda i, n: (0, 0)),          # resident
            pl.BlockSpec((1, C_in, tn), lambda i, n: (i, 0, n)),
        ],
        out_specs=pl.BlockSpec((1, C_out, tn), lambda i, n: (i, 0, n)),
        compiler_params=pltpu.CompilerParams(
            dimension_semantics=("parallel", "parallel"),
            vmem_limit_bytes=_VMEM_LIMIT),
    )(w, b2, x_flat)


# ----------------------------------------------------------------------------
# Query- and key-tiled attention (online softmax) fused with the output
# 1x1 conv + bias + residual.  Grid = (B, N/TQ, N/TK), key axis innermost.
# Per (batch, q-tile), accumulated over key tiles in f32 scratch:
#   th       = theta1 + theta2 + theta3 (f32 sum, bf16 rounded)    (Ci, TQ)
#   S        = th^T @ phi_tile                                     (TQ, TK)
#   m,l,acc  = online-softmax stats / P@g^T accumulator            f32
# Finalize (last key tile):
#   t = acc / l ;  y = out_w @ t^T + out_b + x                     (C_out, TQ)
# ----------------------------------------------------------------------------
def _attn_out_kernel(t1_ref, t2_ref, t3_ref, phi_ref, g_ref, ow_ref, ob_ref,
                     x_ref, y_ref, th_sc, m_sc, l_sc, acc_sc,
                     *, tk, n_real, kv_resident, exp_dtype):
    kk = pl.program_id(2)

    @pl.when(kk == 0)
    def _init():
        # theta sum in f32, single bf16 rounding; the softmax scale is folded
        # into the phi weights, so no per-tile multiply here.
        th = (t1_ref[0].astype(jnp.float32)
              + t2_ref[0].astype(jnp.float32)
              + t3_ref[0].astype(jnp.float32))
        th_sc[...] = th.astype(th_sc.dtype)
        m_sc[...] = jnp.full(m_sc.shape, -jnp.inf, m_sc.dtype)
        l_sc[...] = jnp.zeros(l_sc.shape, l_sc.dtype)
        acc_sc[...] = jnp.zeros(acc_sc.shape, acc_sc.dtype)

    if kv_resident:
        # phi / g are full-N per-batch residents; slice the current key tile.
        off = pl.multiple_of(kk * tk, 128)
        phi = phi_ref[0, :, pl.ds(off, tk)]                         # (Ci, TK)
        g = g_ref[0, :, pl.ds(off, tk)]                             # (Ci, TK)
    else:
        phi = phi_ref[0]                                            # (Ci, TK)
        g = g_ref[0]                                                # (Ci, TK)

    # S[q, k] = sum_c th[c, q] * phi[c, k]  (bf16 MXU operands, f32 accum).
    s = jax.lax.dot_general(th_sc[...], phi,
                            dimension_numbers=(((0,), (0,)), ((), ())),
                            preferred_element_type=jnp.float32)     # (TQ, TK)

    if n_real is not None:
        # N was padded up to a tile multiple: mask the padded key columns.
        kidx = kk * tk + jax.lax.broadcasted_iota(jnp.int32, s.shape, 1)
        s = jnp.where(kidx < n_real, s, -jnp.inf)

    # Online softmax: statistics in f32; exp in bf16 on v6e/v7x (bf16 EUP, no
    # separate full-tile cast before the matmul), f32 on v5e.
    m_prev = m_sc[...]
    m_new = jnp.maximum(m_prev, jnp.max(s, axis=-1, keepdims=True))  # (TQ, 1)
    alpha = jnp.exp(m_prev - m_new)                                  # (TQ, 1)
    e = jnp.exp((s - m_new).astype(exp_dtype))                       # (TQ, TK)
    l_sc[...] = alpha * l_sc[...] + jnp.sum(e, axis=-1, keepdims=True,
                                            dtype=jnp.float32)
    # acc[q, c] += sum_k e[q, k] * g[c, k] — transposed-RHS contraction against
    # channel-major g (no external (N, Ci) transpose, no lane-narrow operand).
    pg = jax.lax.dot_general(e.astype(jnp.bfloat16), g,
                             dimension_numbers=(((1,), (1,)), ((), ())),
                             preferred_element_type=jnp.float32)     # (TQ, Ci)
    acc_sc[...] = alpha * acc_sc[...] + pg
    m_sc[...] = m_new

    @pl.when(kk == pl.num_programs(2) - 1)
    def _finalize():
        t = acc_sc[...] * pl.reciprocal(l_sc[...], approx=True)      # (TQ, Ci)
        # Fused output 1x1 conv + bias + residual (channel-major output):
        #   y[o, q] = sum_c out_w[o, c] * t[q, c] + out_b[o] + x[o, q]
        y = jax.lax.dot_general(ow_ref[...], t,
                                dimension_numbers=(((1,), (1,)), ((), ())),
                                preferred_element_type=jnp.float32)  # (Co, TQ)
        y_ref[0] = (y + ob_ref[...] + x_ref[0]).astype(y_ref.dtype)


def fused_attention_out(theta1, theta2, theta3, phi, g, x_flat, out_w, out_b,
                        tq, tk, n_real=None, exp_dtype=None):
    B, Ci, Np = phi.shape
    C_in = x_flat.shape[1]
    C_out = out_w.shape[0]
    assert Np % tq == 0 and Np % tk == 0
    if exp_dtype is None:
        exp_dtype = _default_exp_dtype()

    # VMEM-budget-driven mode selection (matters on v7x's 64 MiB):
    #   resident : phi/g full-N per batch, read from HBM once per batch.
    #   streamed : phi/g fetched per key tile (more HBM traffic, O(TQ*TK) VMEM).
    budget = int(_VMEM_LIMIT * 0.7)
    kv_resident = _attn_vmem_bytes(Ci, C_in, C_out, Np, tq, tk, True) <= budget
    if (not kv_resident and
            _attn_vmem_bytes(Ci, C_in, C_out, Np, tq, tk, False) > budget):
        tq = tk = 128  # always divide Np (Np is a multiple of 128)

    kv_len = Np if kv_resident else tk
    if kv_resident:
        kv_map = lambda b, q, k: (b, 0, 0)
    else:
        kv_map = lambda b, q, k: (b, 0, k)

    kernel = functools.partial(_attn_out_kernel, tk=tk, n_real=n_real,
                               kv_resident=kv_resident, exp_dtype=exp_dtype)
    ob2 = out_b.reshape(C_out, 1)
    # NOTE: the per-batch residents (phi/g/out_w/out_b) are still double-
    # buffered by default; pipeline_mode=pl.Buffered(1) would halve that once
    # validated on the target jax version.
    return pl.pallas_call(
        kernel,
        out_shape=jax.ShapeDtypeStruct((B, C_out, Np), x_flat.dtype),
        grid=(B, Np // tq, Np // tk),
        in_specs=[
            pl.BlockSpec((1, Ci, tq), lambda b, q, k: (b, 0, q)),    # theta1
            pl.BlockSpec((1, Ci, tq), lambda b, q, k: (b, 0, q)),    # theta2
            pl.BlockSpec((1, Ci, tq), lambda b, q, k: (b, 0, q)),    # theta3
            pl.BlockSpec((1, Ci, kv_len), kv_map),                   # phi
            pl.BlockSpec((1, Ci, kv_len), kv_map),                   # g
            pl.BlockSpec((C_out, Ci), lambda b, q, k: (0, 0)),       # out_w
            pl.BlockSpec((C_out, 1), lambda b, q, k: (0, 0)),        # out_b
            pl.BlockSpec((1, C_in, tq), lambda b, q, k: (b, 0, q)),  # residual
        ],
        out_specs=pl.BlockSpec((1, C_out, tq), lambda b, q, k: (b, 0, q)),
        scratch_shapes=[
            pltpu.VMEM((Ci, tq), jnp.bfloat16),   # summed theta tile
            pltpu.VMEM((tq, 1), jnp.float32),     # running max
            pltpu.VMEM((tq, 1), jnp.float32),     # running denominator
            pltpu.VMEM((tq, Ci), jnp.float32),    # running numerator
        ],
        compiler_params=pltpu.CompilerParams(
            dimension_semantics=("parallel", "parallel", "arbitrary"),
            vmem_limit_bytes=_VMEM_LIMIT),
    )(theta1, theta2, theta3, phi, g, out_w, ob2, x_flat)


# ----------------------------------------------------------------------------
# Parameter init (matches module: Conv2d weights ~ N(0, 0.01), bias = 0)
# ----------------------------------------------------------------------------
def init_params(key, dim_in, dim_inner, dim_out):
    keys = jax.random.split(key, 6)

    def conv_w(k, c_out, c_in):
        return 0.01 * jax.random.normal(k, (c_out, c_in), jnp.float32)

    return {
        "theta1_w": conv_w(keys[0], dim_inner, dim_in),
        "theta1_b": jnp.zeros((dim_inner,), jnp.float32),
        "theta2_w": conv_w(keys[1], dim_inner * 4, dim_in),
        "theta2_b": jnp.zeros((dim_inner * 4,), jnp.float32),
        "theta3_w": conv_w(keys[2], dim_inner * 16, dim_in),
        "theta3_b": jnp.zeros((dim_inner * 16,), jnp.float32),
        "phi_w": conv_w(keys[3], dim_inner, dim_in),
        "phi_b": jnp.zeros((dim_inner,), jnp.float32),
        "g_w": conv_w(keys[4], dim_inner, dim_in),
        "g_b": jnp.zeros((dim_inner,), jnp.float32),
        "out_w": conv_w(keys[5], dim_out, dim_inner),
        "out_b": jnp.zeros((dim_out,), jnp.float32),
    }


# ----------------------------------------------------------------------------
# Forward pass (Pallas-backed)
# ----------------------------------------------------------------------------
def ms_nonlocal2d(params, x, dim_inner, use_scale=True,
                  q_tile=256, k_tile=256, n_tile=1024, exp_dtype=None):
    B, C_in, H, W = x.shape
    N = H * W
    assert H % 4 == 0 and W % 4 == 0, "module requires H, W divisible by 4"
    C_out = params["out_w"].shape[0]
    assert C_out == C_in, "residual needs dim_out == dim_in"

    n_pad, tq, tk = _attn_tiles(N, q_tile, k_tile)
    pad_n = n_pad - N

    x_flat = x.reshape(B, C_in, N)
    x_flat_p = jnp.pad(x_flat, ((0, 0), (0, 0), (0, pad_n))) if pad_n else x_flat

    # Fold the softmax scale into the phi conv (once, in f32, tiny tensors).
    scale = float(dim_inner) ** (-0.5) if use_scale else 1.0
    phi_w = params["phi_w"] * scale
    phi_b = params["phi_b"] * scale

    # Fused theta1 / phi / g projections: one pass over x, bf16 outputs.
    # (padded columns of x just produce bias values; padded keys are masked
    #  in the attention kernel and padded queries are sliced off at the end.)
    theta1, phi, g = fused_projection(
        x_flat_p, params["theta1_w"], params["theta1_b"],
        phi_w, phi_b, params["g_w"], params["g_b"], tile_n=n_tile)

    # theta scale 2: 1x1 conv stride 2 == 1x1 conv on the stride-2 subsample;
    # torch's NCHW-contiguous .view(B, dim_inner, -1) is a free reshape here.
    # TODO(synk): fuse the ::2 / ::4 subsampling into the conv kernels
    # (strided DMA / in-kernel strided slice) to avoid materializing xs2/xs3.
    xs2 = x[:, :, ::2, ::2]
    H2, W2 = xs2.shape[2], xs2.shape[3]
    t2 = conv1x1(xs2.reshape(B, C_in, H2 * W2), params["theta2_w"],
                 params["theta2_b"], out_dtype=jnp.bfloat16, tile_n=n_tile)
    theta2 = t2.reshape(B, dim_inner, 4 * H2 * W2)                 # (B, Ci, N)

    # theta scale 3: 1x1 conv stride 4
    xs3 = x[:, :, ::4, ::4]
    H4, W4 = xs3.shape[2], xs3.shape[3]
    t3 = conv1x1(xs3.reshape(B, C_in, H4 * W4), params["theta3_w"],
                 params["theta3_b"], out_dtype=jnp.bfloat16, tile_n=n_tile)
    theta3 = t3.reshape(B, dim_inner, 16 * H4 * W4)                # (B, Ci, N)

    if pad_n:
        theta2 = jnp.pad(theta2, ((0, 0), (0, 0), (0, pad_n)))
        theta3 = jnp.pad(theta3, ((0, 0), (0, 0), (0, pad_n)))

    y = fused_attention_out(theta1, theta2, theta3, phi, g, x_flat_p,
                            params["out_w"], params["out_b"],
                            tq=tq, tk=tk,
                            n_real=(N if pad_n else None),
                            exp_dtype=exp_dtype)                   # (B, Co, Np)
    if pad_n:
        y = y[:, :, :N]
    return y.reshape(B, C_out, H, W)


# ----------------------------------------------------------------------------
# Pure-JAX reference (mirrors the PyTorch forward) for correctness check.
# ----------------------------------------------------------------------------
def ms_nonlocal2d_ref(params, x, dim_inner, use_scale=True):
    B, _, H, W = x.shape

    def conv(xx, w, b):
        return jnp.einsum("oc,bchw->bohw", w, xx) + b[None, :, None, None]

    t1 = conv(x, params["theta1_w"], params["theta1_b"])
    t1 = t1.reshape(B, dim_inner, -1).transpose(0, 2, 1)
    t2 = conv(x[:, :, ::2, ::2], params["theta2_w"], params["theta2_b"])
    t2 = t2.reshape(B, dim_inner, -1).transpose(0, 2, 1)
    t3 = conv(x[:, :, ::4, ::4], params["theta3_w"], params["theta3_b"])
    t3 = t3.reshape(B, dim_inner, -1).transpose(0, 2, 1)
    phi = conv(x, params["phi_w"], params["phi_b"]).reshape(B, dim_inner, -1)
    g = conv(x, params["g_w"], params["g_b"]).reshape(B, dim_inner, -1)
    s = t1 @ phi + t2 @ phi + t3 @ phi
    if use_scale:
        s = s * (dim_inner ** -0.5)
    p = jax.nn.softmax(s, axis=-1)
    t = g @ jnp.transpose(p, (0, 2, 1))
    t = t.reshape(B, dim_inner, H, W)
    y = conv(t, params["out_w"], params["out_b"])
    return y + x


if __name__ == "__main__":
    dim_in, dim_inner, dim_out = 16, 8, 16   # dim_out == dim_in (residual add)
    B = 2

    key = jax.random.PRNGKey(0)
    kp, kx1, kx2 = jax.random.split(key, 3)
    params = init_params(kp, dim_in, dim_inner, dim_out)

    # Config A: N = 256 (tile-friendly).  Config B: H=W=20 -> N = 400, which
    # exercises the padding + key-masking path.  Small 128 tiles so the
    # (batch, q, k) grid has multiple key steps (online softmax accumulation).
    for (H, W, kx) in [(16, 16, kx1), (20, 20, kx2)]:
        x = jax.random.normal(kx, (B, dim_in, H, W), jnp.float32)
        fwd = jax.jit(functools.partial(ms_nonlocal2d, dim_inner=dim_inner,
                                        use_scale=True, q_tile=128, k_tile=128))
        out = jax.block_until_ready(fwd(params, x))

        ref = ms_nonlocal2d_ref(params, x, dim_inner, use_scale=True)
        assert out.shape == (B, dim_out, H, W)
        max_err = float(jnp.max(jnp.abs(out - ref)))
        assert jnp.allclose(out, ref, atol=2e-3, rtol=2e-3), \
            f"max err {max_err} at H={H}, W={W}"

    print("KERNEL_OK")
</pallas_src>

<mosaic_0001>
module attributes {stable_mosaic.version = 11 : i64} {
  func.func @_proj3_kernel(%arg0: i32, %arg1: i32, %arg2: memref<24x16xf32, #tpu.memory_space<vmem>>, %arg3: memref<24x1xf32, #tpu.memory_space<vmem>>, %arg4: memref<1x16x256xf32, #tpu.memory_space<vmem>>, %arg5: memref<1x8x256xbf16, #tpu.memory_space<vmem>>, %arg6: memref<1x8x256xbf16, #tpu.memory_space<vmem>>, %arg7: memref<1x8x256xbf16, #tpu.memory_space<vmem>>) attributes {dimension_semantics = [#tpu.dimension_semantics<parallel>, #tpu.dimension_semantics<parallel>], iteration_bounds = array<i64: 2, 1>, scalar_prefetch = 0 : i64, scratch_operands = 0 : i64, tpu.core_type = #tpu.core_type<tc>, window_params = [{pipeline_mode = #tpu.pipeline_mode<synchronous>, transform_indices = @transform_0, window_bounds = array<i64: 24, 16>}, {pipeline_mode = #tpu.pipeline_mode<synchronous>, transform_indices = @transform_1, window_bounds = array<i64: 24, 1>}, {transform_indices = @transform_2, window_bounds = array<i64: 1, 16, 256>}, {transform_indices = @transform_3, window_bounds = array<i64: 1, 8, 256>}, {transform_indices = @transform_4, window_bounds = array<i64: 1, 8, 256>}, {transform_indices = @transform_5, window_bounds = array<i64: 1, 8, 256>}]} {
    %c0 = arith.constant 0 : index
    %c0_0 = arith.constant 0 : index
    %0 = vector.load %arg2[%c0, %c0_0] : memref<24x16xf32, #tpu.memory_space<vmem>>, vector<24x16xf32>
    %c0_1 = arith.constant 0 : index
    %c0_2 = arith.constant 0 : index
    %c0_3 = arith.constant 0 : index
    %1 = vector.load %arg4[%c0_1, %c0_2, %c0_3] : memref<1x16x256xf32, #tpu.memory_space<vmem>>, vector<1x16x256xf32>
    %2 = vector.shape_cast %1 : vector<1x16x256xf32> to vector<16x256xf32>
    %cst = arith.constant dense<0.000000e+00> : vector<24x256xf32>
    %3 = tpu.matmul %0, %2, %cst {dimension_numbers = #tpu.dot_dimension_numbers<[1], [0], [0], [1], [0, 0, 1, 1], [], []>} : vector<24x16xf32>, vector<16x256xf32>, vector<24x256xf32> -> vector<24x256xf32>
    %c0_4 = arith.constant 0 : index
    %c0_5 = arith.constant 0 : index
    %4 = vector.load %arg3[%c0_4, %c0_5] : memref<24x1xf32, #tpu.memory_space<vmem>>, vector<24x1xf32>
    %5 = vector.broadcast %4 : vector<24x1xf32> to vector<24x256xf32>
    %6 = arith.addf %3, %5 : vector<24x256xf32>
    %7 = vector.extract_strided_slice %6 {offsets = [0, 0], sizes = [8, 256], strides = [1, 1]} : vector<24x256xf32> to vector<8x256xf32>
    %8 = arith.truncf %7 : vector<8x256xf32> to vector<8x256xbf16>
    %c0_6 = arith.constant 0 : index
    %c0_7 = arith.constant 0 : index
    %c0_8 = arith.constant 0 : index
    %9 = vector.load %arg5[%c0_6, %c0_7, %c0_8] : memref<1x8x256xbf16, #tpu.memory_space<vmem>>, vector<1x8x256xbf16>
    %10 = vector.shape_cast %9 : vector<1x8x256xbf16> to vector<8x256xbf16>
    %11 = vector.shape_cast %8 : vector<8x256xbf16> to vector<1x8x256xbf16>
    tpu.vector_store %arg5[%c0_6, %c0_7, %c0_8], %11 {strides = array<i32>} : memref<1x8x256xbf16, #tpu.memory_space<vmem>>, vector<1x8x256xbf16>,
    %12 = vector.extract_strided_slice %6 {offsets = [8, 0], sizes = [8, 256], strides = [1, 1]} : vector<24x256xf32> to vector<8x256xf32>
    %13 = arith.truncf %12 : vector<8x256xf32> to vector<8x256xbf16>
    %c0_9 = arith.constant 0 : index
    %c0_10 = arith.constant 0 : index
    %c0_11 = arith.constant 0 : index
    %14 = vector.load %arg6[%c0_9, %c0_10, %c0_11] : memref<1x8x256xbf16, #tpu.memory_space<vmem>>, vector<1x8x256xbf16>
    %15 = vector.shape_cast %14 : vector<1x8x256xbf16> to vector<8x256xbf16>
    %16 = vector.shape_cast %13 : vector<8x256xbf16> to vector<1x8x256xbf16>
    tpu.vector_store %arg6[%c0_9, %c0_10, %c0_11], %16 {strides = array<i32>} : memref<1x8x256xbf16, #tpu.memory_space<vmem>>, vector<1x8x256xbf16>,
    %17 = vector.extract_strided_slice %6 {offsets = [16, 0], sizes = [8, 256], strides = [1, 1]} : vector<24x256xf32> to vector<8x256xf32>
    %18 = arith.truncf %17 : vector<8x256xf32> to vector<8x256xbf16>
    %c0_12 = arith.constant 0 : index
    %c0_13 = arith.constant 0 : index
    %c0_14 = arith.constant 0 : index
    %19 = vector.load %arg7[%c0_12, %c0_13, %c0_14] : memref<1x8x256xbf16, #tpu.memory_space<vmem>>, vector<1x8x256xbf16>
    %20 = vector.shape_cast %19 : vector<1x8x256xbf16> to vector<8x256xbf16>
    %21 = vector.shape_cast %18 : vector<8x256xbf16> to vector<1x8x256xbf16>
    tpu.vector_store %arg7[%c0_12, %c0_13, %c0_14], %21 {strides = array<i32>} : memref<1x8x256xbf16, #tpu.memory_space<vmem>>, vector<1x8x256xbf16>,
    return
  }
  func.func @transform_0(%arg0: i32, %arg1: i32) -> (i32, i32) {
    %c0_i32 = arith.constant 0 : i32
    %c0_i32_0 = arith.constant 0 : i32
    %c0_i32_1 = arith.constant 0 : i32
    return %c0_i32, %c0_i32_0 : i32, i32
  }
  func.func @transform_1(%arg0: i32, %arg1: i32) -> (i32, i32) {
    %c0_i32 = arith.constant 0 : i32
    %c0_i32_0 = arith.constant 0 : i32
    %c0_i32_1 = arith.constant 0 : i32
    return %c0_i32, %c0_i32_0 : i32, i32
  }
  func.func @transform_2(%arg0: i32, %arg1: i32) -> (i32, i32, i32) {
    %c0_i32 = arith.constant 0 : i32
    %c0_i32_0 = arith.constant 0 : i32
    return %arg0, %c0_i32, %arg1 : i32, i32, i32
  }
  func.func @transform_3(%arg0: i32, %arg1: i32) -> (i32, i32, i32) {
    %c0_i32 = arith.constant 0 : i32
    %c0_i32_0 = arith.constant 0 : i32
    return %arg0, %c0_i32, %arg1 : i32, i32, i32
  }
  func.func @transform_4(%arg0: i32, %arg1: i32) -> (i32, i32, i32) {
    %c0_i32 = arith.constant 0 : i32
    %c0_i32_0 = arith.constant 0 : i32
    return %arg0, %c0_i32, %arg1 : i32, i32, i32
  }
  func.func @transform_5(%arg0: i32, %arg1: i32) -> (i32, i32, i32) {
    %c0_i32 = arith.constant 0 : i32
    %c0_i32_0 = arith.constant 0 : i32
    return %arg0, %c0_i32, %arg1 : i32, i32, i32
  }
}

module attributes {stable_mosaic.version = 11 : i64} {
  func.func @_conv1x1_kernel(%arg0: i32, %arg1: i32, %arg2: memref<128x16xf32, #tpu.memory_space<vmem>>, %arg3: memref<128x1xf32, #tpu.memory_space<vmem>>, %arg4: memref<1x16x16xf32, #tpu.memory_space<vmem>>, %arg5: memref<1x128x16xbf16, #tpu.memory_space<vmem>>) attributes {dimension_semantics = [#tpu.dimension_semantics<parallel>, #tpu.dimension_semantics<parallel>], iteration_bounds = array<i64: 2, 1>, scalar_prefetch = 0 : i64, scratch_operands = 0 : i64, tpu.core_type = #tpu.core_type<tc>, window_params = [{pipeline_mode = #tpu.pipeline_mode<synchronous>, transform_indices = @transform_0, window_bounds = array<i64: 128, 16>}, {pipeline_mode = #tpu.pipeline_mode<synchronous>, transform_indices = @transform_1, window_bounds = array<i64: 128, 1>}, {transform_indices = @transform_2, window_bounds = array<i64: 1, 16, 16>}, {transform_indices = @transform_3, window_bounds = array<i64: 1, 128, 16>}]} {
    %c0 = arith.constant 0 : index
    %c0_0 = arith.constant 0 : index
    %0 = vector.load %arg2[%c0, %c0_0] : memref<128x16xf32, #tpu.memory_space<vmem>>, vector<128x16xf32>
    %c0_1 = arith.constant 0 : index
    %c0_2 = arith.constant 0 : index
    %c0_3 = arith.constant 0 : index
    %1 = vector.load %arg4[%c0_1, %c0_2, %c0_3] : memref<1x16x16xf32, #tpu.memory_space<vmem>>, vector<1x16x16xf32>
    %2 = vector.shape_cast %1 : vector<1x16x16xf32> to vector<16x16xf32>
    %cst = arith.constant dense<0.000000e+00> : vector<128x16xf32>
    %3 = tpu.matmul %0, %2, %cst {dimension_numbers = #tpu.dot_dimension_numbers<[1], [0], [0], [1], [0, 0, 1, 1], [], []>} : vector<128x16xf32>, vector<16x16xf32>, vector<128x16xf32> -> vector<128x16xf32>
    %c0_4 = arith.constant 0 : index
    %c0_5 = arith.constant 0 : index
    %4 = vector.load %arg3[%c0_4, %c0_5] : memref<128x1xf32, #tpu.memory_space<vmem>>, vector<128x1xf32>
    %5 = vector.broadcast %4 : vector<128x1xf32> to vector<128x16xf32>
    %6 = arith.addf %3, %5 : vector<128x16xf32>
    %7 = arith.truncf %6 : vector<128x16xf32> to vector<128x16xbf16>
    %c0_6 = arith.constant 0 : index
    %c0_7 = arith.constant 0 : index
    %c0_8 = arith.constant 0 : index
    %8 = vector.load %arg5[%c0_6, %c0_7, %c0_8] : memref<1x128x16xbf16, #tpu.memory_space<vmem>>, vector<1x128x16xbf16>
    %9 = vector.shape_cast %8 : vector<1x128x16xbf16> to vector<128x16xbf16>
    %10 = vector.shape_cast %7 : vector<128x16xbf16> to vector<1x128x16xbf16>
    tpu.vector_store %arg5[%c0_6, %c0_7, %c0_8], %10 {strides = array<i32>} : memref<1x128x16xbf16, #tpu.memory_space<vmem>>, vector<1x128x16xbf16>,
    return
  }
  func.func @transform_0(%arg0: i32, %arg1: i32) -> (i32, i32) {
    %c0_i32 = arith.constant 0 : i32
    %c0_i32_0 = arith.constant 0 : i32
    %c0_i32_1 = arith.constant 0 : i32
    return %c0_i32, %c0_i32_0 : i32, i32
  }
  func.func @transform_1(%arg0: i32, %arg1: i32) -> (i32, i32) {
    %c0_i32 = arith.constant 0 : i32
    %c0_i32_0 = arith.constant 0 : i32
    %c0_i32_1 = arith.constant 0 : i32
    return %c0_i32, %c0_i32_0 : i32, i32
  }
  func.func @transform_2(%arg0: i32, %arg1: i32) -> (i32, i32, i32) {
    %c0_i32 = arith.constant 0 : i32
    %c0_i32_0 = arith.constant 0 : i32
    return %arg0, %c0_i32, %arg1 : i32, i32, i32
  }
  func.func @transform_3(%arg0: i32, %arg1: i32) -> (i32, i32, i32) {
    %c0_i32 = arith.constant 0 : i32
    %c0_i32_0 = arith.constant 0 : i32
    return %arg0, %c0_i32, %arg1 : i32, i32, i32
  }
}

module attributes {stable_mosaic.version = 11 : i64} {
  func.func @_conv1x1_kernel(%arg0: i32, %arg1: i32, %arg2: memref<32x16xf32, #tpu.memory_space<vmem>>, %arg3: memref<32x1xf32, #tpu.memory_space<vmem>>, %arg4: memref<1x16x64xf32, #tpu.memory_space<vmem>>, %arg5: memref<1x32x64xbf16, #tpu.memory_space<vmem>>) attributes {dimension_semantics = [#tpu.dimension_semantics<parallel>, #tpu.dimension_semantics<parallel>], iteration_bounds = array<i64: 2, 1>, scalar_prefetch = 0 : i64, scratch_operands = 0 : i64, tpu.core_type = #tpu.core_type<tc>, window_params = [{pipeline_mode = #tpu.pipeline_mode<synchronous>, transform_indices = @transform_0, window_bounds = array<i64: 32, 16>}, {pipeline_mode = #tpu.pipeline_mode<synchronous>, transform_indices = @transform_1, window_bounds = array<i64: 32, 1>}, {transform_indices = @transform_2, window_bounds = array<i64: 1, 16, 64>}, {transform_indices = @transform_3, window_bounds = array<i64: 1, 32, 64>}]} {
    %c0 = arith.constant 0 : index
    %c0_0 = arith.constant 0 : index
    %0 = vector.load %arg2[%c0, %c0_0] : memref<32x16xf32, #tpu.memory_space<vmem>>, vector<32x16xf32>
    %c0_1 = arith.constant 0 : index
    %c0_2 = arith.constant 0 : index
    %c0_3 = arith.constant 0 : index
    %1 = vector.load %arg4[%c0_1, %c0_2, %c0_3] : memref<1x16x64xf32, #tpu.memory_space<vmem>>, vector<1x16x64xf32>
    %2 = vector.shape_cast %1 : vector<1x16x64xf32> to vector<16x64xf32>
    %cst = arith.constant dense<0.000000e+00> : vector<32x64xf32>
    %3 = tpu.matmul %0, %2, %cst {dimension_numbers = #tpu.dot_dimension_numbers<[1], [0], [0], [1], [0, 0, 1, 1], [], []>} : vector<32x16xf32>, vector<16x64xf32>, vector<32x64xf32> -> vector<32x64xf32>
    %c0_4 = arith.constant 0 : index
    %c0_5 = arith.constant 0 : index
    %4 = vector.load %arg3[%c0_4, %c0_5] : memref<32x1xf32, #tpu.memory_space<vmem>>, vector<32x1xf32>
    %5 = vector.broadcast %4 : vector<32x1xf32> to vector<32x64xf32>
    %6 = arith.addf %3, %5 : vector<32x64xf32>
    %7 = arith.truncf %6 : vector<32x64xf32> to vector<32x64xbf16>
    %c0_6 = arith.constant 0 : index
    %c0_7 = arith.constant 0 : index
    %c0_8 = arith.constant 0 : index
    %8 = vector.load %arg5[%c0_6, %c0_7, %c0_8] : memref<1x32x64xbf16, #tpu.memory_space<vmem>>, vector<1x32x64xbf16>
    %9 = vector.shape_cast %8 : vector<1x32x64xbf16> to vector<32x64xbf16>
    %10 = vector.shape_cast %7 : vector<32x64xbf16> to vector<1x32x64xbf16>
    tpu.vector_store %arg5[%c0_6, %c0_7, %c0_8], %10 {strides = array<i32>} : memref<1x32x64xbf16, #tpu.memory_space<vmem>>, vector<1x32x64xbf16>,
    return
  }
  func.func @transform_0(%arg0: i32, %arg1: i32) -> (i32, i32) {
    %c0_i32 = arith.constant 0 : i32
    %c0_i32_0 = arith.constant 0 : i32
    %c0_i32_1 = arith.constant 0 : i32
    return %c0_i32, %c0_i32_0 : i32, i32
  }
  func.func @transform_1(%arg0: i32, %arg1: i32) -> (i32, i32) {
    %c0_i32 = arith.constant 0 : i32
    %c0_i32_0 = arith.constant 0 : i32
    %c0_i32_1 = arith.constant 0 : i32
    return %c0_i32, %c0_i32_0 : i32, i32
  }
  func.func @transform_2(%arg0: i32, %arg1: i32) -> (i32, i32, i32) {
    %c0_i32 = arith.constant 0 : i32
    %c0_i32_0 = arith.constant 0 : i32
    return %arg0, %c0_i32, %arg1 : i32, i32, i32
  }
  func.func @transform_3(%arg0: i32, %arg1: i32) -> (i32, i32, i32) {
    %c0_i32 = arith.constant 0 : i32
    %c0_i32_0 = arith.constant 0 : i32
    return %arg0, %c0_i32, %arg1 : i32, i32, i32
  }
}

module attributes {stable_mosaic.version = 11 : i64} {
  func.func @_attn_out_kernel(%arg0: i32, %arg1: i32, %arg2: i32, %arg3: memref<1x8x128xbf16, #tpu.memory_space<vmem>>, %arg4: memref<1x8x128xbf16, #tpu.memory_space<vmem>>, %arg5: memref<1x8x128xbf16, #tpu.memory_space<vmem>>, %arg6: memref<1x8x256xbf16, #tpu.memory_space<vmem>>, %arg7: memref<1x8x256xbf16, #tpu.memory_space<vmem>>, %arg8: memref<16x8xf32, #tpu.memory_space<vmem>>, %arg9: memref<16x1xf32, #tpu.memory_space<vmem>>, %arg10: memref<1x16x128xf32, #tpu.memory_space<vmem>>, %arg11: memref<1x16x128xf32, #tpu.memory_space<vmem>>, %arg12: memref<8x128xbf16, #tpu.memory_space<vmem>>, %arg13: memref<128x1xf32, #tpu.memory_space<vmem>>, %arg14: memref<128x1xf32, #tpu.memory_space<vmem>>, %arg15: memref<128x8xf32, #tpu.memory_space<vmem>>) attributes {dimension_semantics = [#tpu.dimension_semantics<parallel>, #tpu.dimension_semantics<parallel>, #tpu.dimension_semantics<arbitrary>], iteration_bounds = array<i64: 2, 2, 2>, scalar_prefetch = 0 : i64, scratch_operands = 4 : i64, tpu.core_type = #tpu.core_type<tc>, window_params = [{transform_indices = @transform_0, window_bounds = array<i64: 1, 8, 128>}, {transform_indices = @transform_1, window_bounds = array<i64: 1, 8, 128>}, {transform_indices = @transform_2, window_bounds = array<i64: 1, 8, 128>}, {transform_indices = @transform_3, window_bounds = array<i64: 1, 8, 256>}, {transform_indices = @transform_4, window_bounds = array<i64: 1, 8, 256>}, {pipeline_mode = #tpu.pipeline_mode<synchronous>, transform_indices = @transform_5, window_bounds = array<i64: 16, 8>}, {pipeline_mode = #tpu.pipeline_mode<synchronous>, transform_indices = @transform_6, window_bounds = array<i64: 16, 1>}, {transform_indices = @transform_7, window_bounds = array<i64: 1, 16, 128>}, {transform_indices = @transform_8, window_bounds = array<i64: 1, 16, 128>}]} {
    %c0_i32 = arith.constant 0 : i32
    %0 = arith.cmpi eq, %arg2, %c0_i32 : i32
    %1 = arith.extui %0 : i1 to i32
    %c0_i32_0 = arith.constant 0 : i32
    %2 = arith.cmpi ne, %1, %c0_i32_0 : i32
    scf.if %2 {
      %c0_22 = arith.constant 0 : index
      %c0_23 = arith.constant 0 : index
      %c0_24 = arith.constant 0 : index
      %40 = vector.load %arg3[%c0_22, %c0_23, %c0_24] : memref<1x8x128xbf16, #tpu.memory_space<vmem>>, vector<1x8x128xbf16>
      %41 = vector.shape_cast %40 : vector<1x8x128xbf16> to vector<8x128xbf16>
      %42 = arith.extf %41 : vector<8x128xbf16> to vector<8x128xf32>
      %c0_25 = arith.constant 0 : index
      %c0_26 = arith.constant 0 : index
      %c0_27 = arith.constant 0 : index
      %43 = vector.load %arg4[%c0_25, %c0_26, %c0_27] : memref<1x8x128xbf16, #tpu.memory_space<vmem>>, vector<1x8x128xbf16>
      %44 = vector.shape_cast %43 : vector<1x8x128xbf16> to vector<8x128xbf16>
      %45 = arith.extf %44 : vector<8x128xbf16> to vector<8x128xf32>
      %46 = arith.addf %42, %45 : vector<8x128xf32>
      %c0_28 = arith.constant 0 : index
      %c0_29 = arith.constant 0 : index
      %c0_30 = arith.constant 0 : index
      %47 = vector.load %arg5[%c0_28, %c0_29, %c0_30] : memref<1x8x128xbf16, #tpu.memory_space<vmem>>, vector<1x8x128xbf16>
      %48 = vector.shape_cast %47 : vector<1x8x128xbf16> to vector<8x128xbf16>
      %49 = arith.extf %48 : vector<8x128xbf16> to vector<8x128xf32>
      %50 = arith.addf %46, %49 : vector<8x128xf32>
      %51 = arith.truncf %50 : vector<8x128xf32> to vector<8x128xbf16>
      %c0_31 = arith.constant 0 : index
      %c0_32 = arith.constant 0 : index
      %52 = vector.load %arg12[%c0_31, %c0_32] : memref<8x128xbf16, #tpu.memory_space<vmem>>, vector<8x128xbf16>
      tpu.vector_store %arg12[%c0_31, %c0_32], %51 {strides = array<i32>} : memref<8x128xbf16, #tpu.memory_space<vmem>>, vector<8x128xbf16>,
      %cst_33 = arith.constant 0xFF800000 : f32
      %53 = vector.broadcast %cst_33 : f32 to vector<128x1xf32>
      %c0_34 = arith.constant 0 : index
      %c0_35 = arith.constant 0 : index
      %54 = vector.load %arg13[%c0_34, %c0_35] : memref<128x1xf32, #tpu.memory_space<vmem>>, vector<128x1xf32>
      tpu.vector_store %arg13[%c0_34, %c0_35], %53 {strides = array<i32>} : memref<128x1xf32, #tpu.memory_space<vmem>>, vector<128x1xf32>,
      %cst_36 = arith.constant 0.000000e+00 : f32
      %55 = vector.broadcast %cst_36 : f32 to vector<128x1xf32>
      %c0_37 = arith.constant 0 : index
      %c0_38 = arith.constant 0 : index
      %56 = vector.load %arg14[%c0_37, %c0_38] : memref<128x1xf32, #tpu.memory_space<vmem>>, vector<128x1xf32>
      tpu.vector_store %arg14[%c0_37, %c0_38], %55 {strides = array<i32>} : memref<128x1xf32, #tpu.memory_space<vmem>>, vector<128x1xf32>,
      %cst_39 = arith.constant 0.000000e+00 : f32
      %57 = vector.broadcast %cst_39 : f32 to vector<128x8xf32>
      %c0_40 = arith.constant 0 : index
      %c0_41 = arith.constant 0 : index
      %58 = vector.load %arg15[%c0_40, %c0_41] : memref<128x8xf32, #tpu.memory_space<vmem>>, vector<128x8xf32>
      tpu.vector_store %arg15[%c0_40, %c0_41], %57 {strides = array<i32>} : memref<128x8xf32, #tpu.memory_space<vmem>>, vector<128x8xf32>,
    } else {
    }
    %c128_i32 = arith.constant 128 : i32
    %3 = arith.muli %arg2, %c128_i32 : i32
    %4 = tpu.assume_multiple %3, 128 : i32
    %c0 = arith.constant 0 : index
    %c0_1 = arith.constant 0 : index
    %5 = arith.index_cast %4 : i32 to index
    %6 = vector.load %arg6[%c0, %c0_1, %5] : memref<1x8x256xbf16, #tpu.memory_space<vmem>>, vector<1x8x128xbf16>
    %7 = vector.shape_cast %6 : vector<1x8x128xbf16> to vector<8x128xbf16>
    %c0_2 = arith.constant 0 : index
    %c0_3 = arith.constant 0 : index
    %8 = arith.index_cast %4 : i32 to index
    %9 = vector.load %arg7[%c0_2, %c0_3, %8] : memref<1x8x256xbf16, #tpu.memory_space<vmem>>, vector<1x8x128xbf16>
    %10 = vector.shape_cast %9 : vector<1x8x128xbf16> to vector<8x128xbf16>
    %c0_4 = arith.constant 0 : index
    %c0_5 = arith.constant 0 : index
    %11 = vector.load %arg12[%c0_4, %c0_5] : memref<8x128xbf16, #tpu.memory_space<vmem>>, vector<8x128xbf16>
    %cst = arith.constant dense<0.000000e+00> : vector<128x128xf32>
    %12 = tpu.matmul %11, %7, %cst {dimension_numbers = #tpu.dot_dimension_numbers<[0], [0], [1], [1], [0, 1, 1, 1], [], []>} : vector<8x128xbf16>, vector<8x128xbf16>, vector<128x128xf32> -> vector<128x128xf32>
    %c0_6 = arith.constant 0 : index
    %c0_7 = arith.constant 0 : index
    %13 = vector.load %arg13[%c0_6, %c0_7] : memref<128x1xf32, #tpu.memory_space<vmem>>, vector<128x1xf32>
    %cst_8 = arith.constant dense<0xFF800000> : vector<128xf32>
    %14 = vector.multi_reduction <maximumf>, %12, %cst_8 [1] : vector<128x128xf32> to vector<128xf32>
    %15 = vector.shape_cast %14 : vector<128xf32> to vector<128x1xf32>
    %16 = arith.maximumf %13, %15 : vector<128x1xf32>
    %17 = arith.subf %13, %16 : vector<128x1xf32>
    %18 = math.exp %17 : vector<128x1xf32>
    %19 = vector.broadcast %16 : vector<128x1xf32> to vector<128x128xf32>
    %20 = arith.subf %12, %19 : vector<128x128xf32>
    %21 = arith.truncf %20 : vector<128x128xf32> to vector<128x128xbf16>
    %22 = math.exp %21 : vector<128x128xbf16>
    %c0_9 = arith.constant 0 : index
    %c0_10 = arith.constant 0 : index
    %23 = vector.load %arg14[%c0_9, %c0_10] : memref<128x1xf32, #tpu.memory_space<vmem>>, vector<128x1xf32>
    %24 = arith.mulf %18, %23 : vector<128x1xf32>
    %25 = arith.extf %22 : vector<128x128xbf16> to vector<128x128xf32>
    %cst_11 = arith.constant dense<0.000000e+00> : vector<128xf32>
    %26 = vector.multi_reduction <add>, %25, %cst_11 [1] : vector<128x128xf32> to vector<128xf32>
    %27 = vector.shape_cast %26 : vector<128xf32> to vector<128x1xf32>
    %28 = arith.addf %24, %27 : vector<128x1xf32>
    %c0_12 = arith.constant 0 : index
    %c0_13 = arith.constant 0 : index
    %29 = vector.load %arg14[%c0_12, %c0_13] : memref<128x1xf32, #tpu.memory_space<vmem>>, vector<128x1xf32>
    tpu.vector_store %arg14[%c0_12, %c0_13], %28 {strides = array<i32>} : memref<128x1xf32, #tpu.memory_space<vmem>>, vector<128x1xf32>,
    %cst_14 = arith.constant dense<0.000000e+00> : vector<128x8xf32>
    %30 = tpu.matmul %22, %10, %cst_14 {dimension_numbers = #tpu.dot_dimension_numbers<[1], [1], [0], [0], [0, 0, 1, 0], [], []>} : vector<128x128xbf16>, vector<8x128xbf16>, vector<128x8xf32> -> vector<128x8xf32>
    %c0_15 = arith.constant 0 : index
    %c0_16 = arith.constant 0 : index
    %31 = vector.load %arg15[%c0_15, %c0_16] : memref<128x8xf32, #tpu.memory_space<vmem>>, vector<128x8xf32>
    %32 = vector.broadcast %18 : vector<128x1xf32> to vector<128x8xf32>
    %33 = arith.mulf %32, %31 : vector<128x8xf32>
    %34 = arith.addf %33, %30 : vector<128x8xf32>
    %c0_17 = arith.constant 0 : index
    %c0_18 = arith.constant 0 : index
    %35 = vector.load %arg15[%c0_17, %c0_18] : memref<128x8xf32, #tpu.memory_space<vmem>>, vector<128x8xf32>
    tpu.vector_store %arg15[%c0_17, %c0_18], %34 {strides = array<i32>} : memref<128x8xf32, #tpu.memory_space<vmem>>, vector<128x8xf32>,
    %c0_19 = arith.constant 0 : index
    %c0_20 = arith.constant 0 : index
    %36 = vector.load %arg13[%c0_19, %c0_20] : memref<128x1xf32, #tpu.memory_space<vmem>>, vector<128x1xf32>
    tpu.vector_store %arg13[%c0_19, %c0_20], %16 {strides = array<i32>} : memref<128x1xf32, #tpu.memory_space<vmem>>, vector<128x1xf32>,
    %c1_i32 = arith.constant 1 : i32
    %37 = arith.cmpi eq, %arg2, %c1_i32 : i32
    %38 = arith.extui %37 : i1 to i32
    %c0_i32_21 = arith.constant 0 : i32
    %39 = arith.cmpi ne, %38, %c0_i32_21 : i32
    scf.if %39 {
      %c0_22 = arith.constant 0 : index
      %c0_23 = arith.constant 0 : index
      %40 = vector.load %arg15[%c0_22, %c0_23] : memref<128x8xf32, #tpu.memory_space<vmem>>, vector<128x8xf32>
      %c0_24 = arith.constant 0 : index
      %c0_25 = arith.constant 0 : index
      %41 = vector.load %arg14[%c0_24, %c0_25] : memref<128x1xf32, #tpu.memory_space<vmem>>, vector<128x1xf32>
      %42 = tpu.reciprocal %41 {approx = true} : vector<128x1xf32> -> vector<128x1xf32>
      %43 = vector.broadcast %42 : vector<128x1xf32> to vector<128x8xf32>
      %44 = arith.mulf %40, %43 : vector<128x8xf32>
      %c0_26 = arith.constant 0 : index
      %c0_27 = arith.constant 0 : index
      %45 = vector.load %arg8[%c0_26, %c0_27] : memref<16x8xf32, #tpu.memory_space<vmem>>, vector<16x8xf32>
      %cst_28 = arith.constant dense<0.000000e+00> : vector<16x128xf32>
      %46 = tpu.matmul %45, %44, %cst_28 {dimension_numbers = #tpu.dot_dimension_numbers<[1], [1], [0], [0], [0, 0, 1, 0], [], []>} : vector<16x8xf32>, vector<128x8xf32>, vector<16x128xf32> -> vector<16x128xf32>
      %c0_29 = arith.constant 0 : index
      %c0_30 = arith.constant 0 : index
      %47 = vector.load %arg9[%c0_29, %c0_30] : memref<16x1xf32, #tpu.memory_space<vmem>>, vector<16x1xf32>
      %48 = vector.broadcast %47 : vector<16x1xf32> to vector<16x128xf32>
      %49 = arith.addf %46, %48 : vector<16x128xf32>
      %c0_31 = arith.constant 0 : index
      %c0_32 = arith.constant 0 : index
      %c0_33 = arith.constant 0 : index
      %50 = vector.load %arg10[%c0_31, %c0_32, %c0_33] : memref<1x16x128xf32, #tpu.memory_space<vmem>>, vector<1x16x128xf32>
      %51 = vector.shape_cast %50 : vector<1x16x128xf32> to vector<16x128xf32>
      %52 = arith.addf %49, %51 : vector<16x128xf32>
      %c0_34 = arith.constant 0 : index
      %c0_35 = arith.constant 0 : index
      %c0_36 = arith.constant 0 : index
      %53 = vector.load %arg11[%c0_34, %c0_35, %c0_36] : memref<1x16x128xf32, #tpu.memory_space<vmem>>, vector<1x16x128xf32>
      %54 = vector.shape_cast %53 : vector<1x16x128xf32> to vector<16x128xf32>
      %55 = vector.shape_cast %52 : vector<16x128xf32> to vector<1x16x128xf32>
      tpu.vector_store %arg11[%c0_34, %c0_35, %c0_36], %55 {strides = array<i32>} : memref<1x16x128xf32, #tpu.memory_space<vmem>>, vector<1x16x128xf32>,
    } else {
    }
    return
  }
  func.func @transform_0(%arg0: i32, %arg1: i32, %arg2: i32) -> (i32, i32, i32) {
    %c0_i32 = arith.constant 0 : i32
    %c0_i32_0 = arith.constant 0 : i32
    return %arg0, %c0_i32, %arg1 : i32, i32, i32
  }
  func.func @transform_1(%arg0: i32, %arg1: i32, %arg2: i32) -> (i32, i32, i32) {
    %c0_i32 = arith.constant 0 : i32
    %c0_i32_0 = arith.constant 0 : i32
    return %arg0, %c0_i32, %arg1 : i32, i32, i32
  }
  func.func @transform_2(%arg0: i32, %arg1: i32, %arg2: i32) -> (i32, i32, i32) {
    %c0_i32 = arith.constant 0 : i32
    %c0_i32_0 = arith.constant 0 : i32
    return %arg0, %c0_i32, %arg1 : i32, i32, i32
  }
  func.func @transform_3(%arg0: i32, %arg1: i32, %arg2: i32) -> (i32, i32, i32) {
    %c0_i32 = arith.constant 0 : i32
    %c0_i32_0 = arith.constant 0 : i32
    %c0_i32_1 = arith.constant 0 : i32
    return %arg0, %c0_i32, %c0_i32_0 : i32, i32, i32
  }
  func.func @transform_4(%arg0: i32, %arg1: i32, %arg2: i32) -> (i32, i32, i32) {
    %c0_i32 = arith.constant 0 : i32
    %c0_i32_0 = arith.constant 0 : i32
    %c0_i32_1 = arith.constant 0 : i32
    return %arg0, %c0_i32, %c0_i32_0 : i32, i32, i32
  }
  func.func @transform_5(%arg0: i32, %arg1: i32, %arg2: i32) -> (i32, i32) {
    %c0_i32 = arith.constant 0 : i32
    %c0_i32_0 = arith.constant 0 : i32
    %c0_i32_1 = arith.constant 0 : i32
    return %c0_i32, %c0_i32_0 : i32, i32
  }
  func.func @transform_6(%arg0: i32, %arg1: i32, %arg2: i32) -> (i32, i32) {
    %c0_i32 = arith.constant 0 : i32
    %c0_i32_0 = arith.constant 0 : i32
    %c0_i32_1 = arith.constant 0 : i32
    return %c0_i32, %c0_i32_0 : i32, i32
  }
  func.func @transform_7(%arg0: i32, %arg1: i32, %arg2: i32) -> (i32, i32, i32) {
    %c0_i32 = arith.constant 0 : i32
    %c0_i32_0 = arith.constant 0 : i32
    return %arg0, %c0_i32, %arg1 : i32, i32, i32
  }
  func.func @transform_8(%arg0: i32, %arg1: i32, %arg2: i32) -> (i32, i32, i32) {
    %c0_i32 = arith.constant 0 : i32
    %c0_i32_0 = arith.constant 0 : i32
    return %arg0, %c0_i32, %arg1 : i32, i32, i32
  }
}

</mosaic_0001>

<bundles_post_ra>
// kernel: ms_nonlocal2d.4
= control target key start
LH: loop header
LB: loop body
LE: loop exit
PB: predicated region body
PF: predicated region fallthrough
CT: control target
= control target key end

     0   :  { %s702_s18 = smov 0   ;;  %s704_s19 = smov 0   ;;  %s765_s0 = inlined_call_operand.vmem [shape: f32[24,16], index: 0, kind: input, shape index: {}]   ;;  %s766_s1 = inlined_call_operand.vmem [shape: f32[24,1], index: 1, kind: input, shape index: {}]   ;;  %s767_s2 = inlined_call_operand.vmem [shape: f32[2,16,256], index: 2, kind: input, shape index: {}]   ;;  %s768_s3 = inlined_call_operand.vmem [shape: bf16[2,8,256], index: 3, kind: output, shape index: {0}]   ;;  %s769_s4 = inlined_call_operand.vmem [shape: bf16[2,8,256], index: 4, kind: output, shape index: {1}]   ;;  %s770_s5 = inlined_call_operand.vmem [shape: bf16[2,8,256], index: 5, kind: output, shape index: {2}]  }
   0x1   :  { %s706_s20 = smov 0  }
   0x2 LB: > { %s28_s21 = sadd.s32 1, %s665_s19  ;;  %p595_p0 = scmp.ge.s32.totalorder %s669_s20, 1  ;;  %s669_s20 = sphi %s706_s20, %s16_s20   ;;  %s665_s19 = sphi %s704_s19, %s772_s19   ;;  %s661_s18 = sphi %s702_s18, %s771_s18  }
   0x3   : > { %p30_p1 = scmp.ge.s32.totalorder %s28_s21, 2  ;;  %p217_p2 = scmp.lt.s32.totalorder %s669_s20, 3 }
   0x5   : > { %s774_s21 = smov (%p30_p1, %s28_s21), 0  ;;  %p218_p3 = pnand %p595_p0, %p217_p2 }
   0x6   : > { %p272_p4 = scmp.lt.s32.totalorder (!%p218_p3), %s661_s18, 1 }
   0x7   : > { %221 = sbr.rel (%p218_p3) target bundleno = 164 (0xa4), region = 32 }
   0xc   : > { %v671_v0 = vmov 0   ;;  %v318_v1 = vld [vmem:[%s766_s1] sm:$0xff]  ;;  %v320_v2 = vld [vmem:[%s766_s1 + $0x10] sm:$0xff]  ;;  %s776_s18 = smov (!%p272_p4, %s661_s18), 1  ;;  %v312_v7 = vld [vmem:[%s765_s0 + $0x8] sm:$0xff]  ;;  %vm336_vm0 = vcmask 130048  }
   0xd   : > { %645 = vset.pattern.permute.xlu0 %v671_v0  ;;  %646 = vset.pattern.permute.xlu1 %v671_v0  ;;  %s612_s26 = sshll.u32 %s776_s18, 5  ;;  %v311_v8 = vld [vmem:[%s765_s0] sm:$0xff]  ;;  %v319_v9 = vld [vmem:[%s766_s1 + $0x8] sm:$0xff]  ;;  %v313_v10 = vld [vmem:[%s765_s0 + $0x10] sm:$0xff]  ;;  %s613_s13 = sshll.u32 %s776_s18, 3 }
   0xe   : > { %323 = vperm.xlu0 %645, %v318_v1   ;;  %333 = vperm.xlu1 %646, %v320_v2   ;;  %s279_s29 = scalar_lea.vmem %s767_s2, %s612_s26  ;;  %s289_s16 = scalar_lea.vmem %s768_s3, %s613_s13 }
   0xf   : > { %v316_v3 = vld [vmem:[%s279_s29 + $0x10] sm:$0xff]  ;;  %v317_v4 = vld [vmem:[%s279_s29 + $0x18] sm:$0xff]  ;;  %v314_v5 = vld [vmem:[%s279_s29] sm:$0xff]  ;;  %s299_s23 = scalar_lea.vmem %s769_s4, %s613_s13  ;;  %s309_s25 = scalar_lea.vmem %s770_s5, %s613_s13 }
  0x10   : > { %616 = vmatpush.msra.mxu2 %v316_v3  ;;  %618 = vmatpush.msra.mxu3 %v317_v4  ;;  %v315_v6 = vld [vmem:[%s279_s29 + $0x8] sm:$0xff] }
  0x11   : > { %360 = vmatpush.msra.mxu0 %v316_v3  ;;  %386 = vmatpush.msra.mxu1 %v317_v4 }
  0x12   : > { %617 = vmatpush.msra.mxu2 %v314_v5  ;;  %619 = vmatpush.msra.mxu3 %v315_v6 }
  0x13   : > { %605 = vmatmul.msk.f32.vlgmr.msra.gmra.mxu2 %vm336_vm0, %v312_v7  ;;  %608 = vmatmul.msk.f32.vlgmr.msra.gmra.mxu3 %vm336_vm0, %v312_v7 }
  0x14   : > { %361 = vmatpush.msra.mxu0 %v314_v5  ;;  %387 = vmatpush.msra.mxu1 %v315_v6 }
  0x15   : > { %604 = vmatmul.msk.f32.vlgmr.msra.gmra.mxu0 %vm336_vm0, %v311_v8  ;;  %607 = vmatmul.msk.f32.vlgmr.msra.gmra.mxu1 %vm336_vm0, %v311_v8 }
  0x16   : > { %328 = vperm.xlu0 %645, %v319_v9  }
  0x1b   : > { %606 = vmatmul.msk.f32.gmra.mxu2 %vm336_vm0, %v313_v10  ;;  %609 = vmatmul.msk.f32.gmra.mxu3 %vm336_vm0, %v313_v10 }
  0x80   : > { %v324_v11 = vpop.permute.xlu0 %323  ;;  %v334_v23 = vpop.permute.xlu1 %333 }
  0x88   : > { %v329_v16 = vpop.permute.xlu0 %328 }
  0x92   : > { %v363_v12 = vpop.f32.mrf.mxu0  ;;  %v389_v13 = vpop.f32.mrf.mxu1 }
  0x93   : > { %v364_v14 = vadd.f32 %v363_v12, %v324_v11  ;;  %v390_v15 = vadd.f32 %v389_v13, %v324_v11 }
  0x95   : > { %v398_v17 = vpack.c.bf16 %v390_v15, %v364_v14 }
  0x96   : > { %v366_v18 = vpop.f32.mrf.mxu2  ;;  %v392_v19 = vpop.f32.mrf.mxu3 }
  0x97   : > { %v367_v20 = vadd.f32 %v366_v18, %v329_v16  ;;  %399 = vst [vmem:[%s289_s16] sm:$0xff] %v398_v17  ;;  %v393_v21 = vadd.f32 %v392_v19, %v329_v16 }
  0x99   : > { %v400_v22 = vpack.c.bf16 %v393_v21, %v367_v20 }
  0x9b   : > { %401 = vst [vmem:[%s299_s23] sm:$0xff] %v400_v22 }
  0x9e   : > { %v369_v24 = vpop.f32.mrf.mxu2  ;;  %v395_v25 = vpop.f32.mrf.mxu3 }
  0x9f   : > { %v370_v26 = vadd.f32 %v369_v24, %v334_v23  ;;  %v396_v27 = vadd.f32 %v395_v25, %v334_v23 }
  0xa1   : > { %v402_v28 = vpack.c.bf16 %v396_v27, %v370_v26 }
  0xa3   : > { %403 = vst [vmem:[%s309_s25] sm:$0xff] %v402_v28 }
  0xa4 PF: > { %s16_s20 = sadd.s32 1, %s669_s20   ;;  %s771_s18 = smov %s665_s19 }
  0xa5   : > { %p13_p5 = scmp.ge.s32.totalorder %s16_s20, 4   ;;  %s772_s19 = smov %s774_s21 }
  0xa7   :  { %15 = sbr.rel (!%p13_p5) target bundleno = 2 (0x2), region = 86 }

// kernel: ms_nonlocal2d.6
= control target key start
LH: loop header
LB: loop body
LE: loop exit
PB: predicated region body
PF: predicated region fallthrough
CT: control target
= control target key end

     0   :  { %s654_s12 = smov 0   ;;  %s656_s13 = smov 0   ;;  %s837_s0 = inlined_call_operand.vmem [shape: f32[128,16], index: 0, kind: input, shape index: {}]   ;;  %s838_s1 = inlined_call_operand.vmem [shape: f32[128,1], index: 1, kind: input, shape index: {}]   ;;  %s839_s2 = inlined_call_operand.vmem [shape: f32[2,16,16], index: 2, kind: input, shape index: {}]   ;;  %s840_s3 = inlined_call_operand.vmem [shape: bf16[2,128,16], index: 3, kind: output, shape index: {}]  }
   0x1   :  { %s658_s14 = smov 0  }
   0x2 LB: > { %s25_s15 = sadd.s32 1, %s627_s13  ;;  %p550_p0 = scmp.ge.s32.totalorder %s631_s14, 1  ;;  %s631_s14 = sphi %s658_s14, %s13_s14   ;;  %s627_s13 = sphi %s656_s13, %s842_s13   ;;  %s623_s12 = sphi %s654_s12, %s841_s12  }
   0x3   : > { %p27_p1 = scmp.ge.s32.totalorder %s25_s15, 2  ;;  %p156_p2 = scmp.lt.s32.totalorder %s631_s14, 3 }
   0x5   : > { %s844_s15 = smov (%p27_p1, %s25_s15), 0  ;;  %p157_p3 = pnand %p550_p0, %p156_p2 }
   0x6   : > { %p186_p4 = scmp.lt.s32.totalorder (!%p157_p3), %s623_s12, 1 }
   0x7   : > { %160 = sbr.rel (%p157_p3) target bundleno = 184 (0xb8), region = 32 }
   0xc   : > { %v222_v0 = vld [vmem:[%s838_s1 + $0x10] sm:$0xff]  ;;  %v220_v1 = vld [vmem:[%s838_s1] sm:$0xff]  ;;  %v633_v2 = vmov 0   ;;  %s846_s12 = smov (!%p186_p4, %s623_s12), 1  ;;  %v223_v6 = vld [vmem:[%s838_s1 + $0x18] sm:$0xff]  ;;  %vm316_vm0 = vcmask 130048  }
   0xd   : > { %607 = vset.pattern.permute.xlu1 %v633_v2  ;;  %606 = vset.pattern.permute.xlu0 %v633_v2  ;;  %v224_v3 = vld [vmem:[%s838_s1 + $0x20] sm:$0xff]  ;;  %s573_s22 = sshll.u32 %s846_s12, 4  ;;  %v221_v7 = vld [vmem:[%s838_s1 + $0x8] sm:$0xff]  ;;  %v227_v13 = vld [vmem:[%s838_s1 + $0x38] sm:$0xff]  ;;  %s574_s11 = sshll.u32 %s846_s12, 6  ;;  %vm446_vm1 = vcmask 125952  }
   0xe   : > { %248 = vperm.xlu1 %607, %v222_v0   ;;  %238 = vperm.xlu0 %606, %v220_v1   ;;  %s193_s25 = scalar_lea.vmem %s839_s2, %s573_s22  ;;  %v202_v8 = vld [vmem:[%s837_s0] sm:$0xff]  ;;  %v225_v12 = vld [vmem:[%s838_s1 + $0x28] sm:$0xff]  ;;  %v226_v14 = vld [vmem:[%s838_s1 + $0x30] sm:$0xff]  ;;  %s794_s18 = scalar_lea.vmem %s840_s3, %s574_s11 }
   0xf   : > { %608 = vset.pattern.permute.xlu2 %v633_v2  ;;  %v219_v4 = vld [vmem:[%s193_s25 + $0x8] sm:$0xff]  ;;  %v218_v5 = vld [vmem:[%s193_s25] sm:$0xff]  ;;  %v230_v20 = vld [vmem:[%s838_s1 + $0x50] sm:$0xff] }
  0x10   : > { %258 = vperm.xlu2 %608, %v224_v3   ;;  %379 = vmatpush.msra.mxu0 %v219_v4  ;;  %v206_v9 = vld [vmem:[%s837_s0 + $0x20] sm:$0xff]  ;;  %v203_v15 = vld [vmem:[%s837_s0 + $0x8] sm:$0xff]  ;;  %v204_v22 = vld [vmem:[%s837_s0 + $0x10] sm:$0xff] }
  0x11   : > { %575 = vmatpush.msra.mxu1 %v219_v4  ;;  %576 = vmatpush.msra.mxu2 %v219_v4  ;;  %v210_v10 = vld [vmem:[%s837_s0 + $0x40] sm:$0xff]  ;;  %v207_v16 = vld [vmem:[%s837_s0 + $0x28] sm:$0xff]  ;;  %v208_v23 = vld [vmem:[%s837_s0 + $0x30] sm:$0xff] }
  0x12   : > { %577 = vmatpush.msra.mxu3 %v219_v4  ;;  %380 = vmatpush.msra.mxu0 %v218_v5  ;;  %v214_v11 = vld [vmem:[%s837_s0 + $0x60] sm:$0xff]  ;;  %v211_v17 = vld [vmem:[%s837_s0 + $0x48] sm:$0xff]  ;;  %v212_v24 = vld [vmem:[%s837_s0 + $0x50] sm:$0xff] }
  0x13   : > { %578 = vmatpush.msra.mxu1 %v218_v5  ;;  %579 = vmatpush.msra.mxu2 %v218_v5  ;;  %v215_v18 = vld [vmem:[%s837_s0 + $0x68] sm:$0xff]  ;;  %v228_v19 = vld [vmem:[%s838_s1 + $0x40] sm:$0xff]  ;;  %v216_v25 = vld [vmem:[%s837_s0 + $0x70] sm:$0xff] }
  0x14   : > { %580 = vmatpush.msra.mxu3 %v218_v5  ;;  %555 = vmatmul.msk.f32.vlgmr.msra.gmra.mxu0 %vm316_vm0, %v202_v8  ;;  %v229_v21 = vld [vmem:[%s838_s1 + $0x48] sm:$0xff]  ;;  %v231_v26 = vld [vmem:[%s838_s1 + $0x58] sm:$0xff]  ;;  %v232_v28 = vld [vmem:[%s838_s1 + $0x60] sm:$0xff] }
  0x15   : > { %559 = vmatmul.msk.f32.vlgmr.msra.gmra.mxu1 %vm316_vm0, %v206_v9  ;;  %563 = vmatmul.msk.f32.vlgmr.msra.gmra.mxu2 %vm316_vm0, %v210_v10  ;;  %v233_v27 = vld [vmem:[%s838_s1 + $0x68] sm:$0xff]  ;;  %v205_v29 = vld [vmem:[%s837_s0 + $0x18] sm:$0xff]  ;;  %v234_v33 = vld [vmem:[%s838_s1 + $0x70] sm:$0xff] }
  0x16   : > { %253 = vperm.xlu1 %607, %v223_v6   ;;  %243 = vperm.xlu0 %606, %v221_v7   ;;  %v209_v30 = vld [vmem:[%s837_s0 + $0x38] sm:$0xff] }
  0x17   : > { %567 = vmatmul.msk.f32.vlgmr.msra.gmra.mxu3 %vm316_vm0, %v214_v11  ;;  %v213_v31 = vld [vmem:[%s837_s0 + $0x58] sm:$0xff] }
  0x18   : > { %263 = vperm.xlu2 %608, %v225_v12   ;;  %v217_v32 = vld [vmem:[%s837_s0 + $0x78] sm:$0xff] }
  0x19   : > { %v235_v34 = vld [vmem:[%s838_s1 + $0x78] sm:$0xff] }
  0x1c   : > { %556 = vmatmul.msk.f32.gmra.mxu0 %vm316_vm0, %v203_v15 }
  0x1d   : > { %560 = vmatmul.msk.f32.gmra.mxu1 %vm316_vm0, %v207_v16  ;;  %564 = vmatmul.msk.f32.gmra.mxu2 %vm316_vm0, %v211_v17 }
  0x1e   : > { %273 = vperm.xlu1 %607, %v227_v13   ;;  %268 = vperm.xlu0 %606, %v226_v14  }
  0x1f   : > { %568 = vmatmul.msk.f32.gmra.mxu3 %vm316_vm0, %v215_v18 }
  0x20   : > { %278 = vperm.xlu2 %608, %v228_v19  }
  0x24   : > { %557 = vmatmul.msk.f32.gmra.mxu0 %vm316_vm0, %v204_v22 }
  0x25   : > { %561 = vmatmul.msk.f32.gmra.mxu1 %vm316_vm0, %v208_v23  ;;  %565 = vmatmul.msk.f32.gmra.mxu2 %vm316_vm0, %v212_v24 }
  0x26   : > { %288 = vperm.xlu1 %607, %v230_v20   ;;  %283 = vperm.xlu0 %606, %v229_v21  }
  0x27   : > { %569 = vmatmul.msk.f32.gmra.mxu3 %vm316_vm0, %v216_v25 }
  0x28   : > { %293 = vperm.xlu2 %608, %v231_v26  }
  0x2c   : > { %558 = vmatmul.msk.f32.gmra.mxu0 %vm316_vm0, %v205_v29 }
  0x2d   : > { %562 = vmatmul.msk.f32.gmra.mxu1 %vm316_vm0, %v209_v30  ;;  %566 = vmatmul.msk.f32.gmra.mxu2 %vm316_vm0, %v213_v31 }
  0x2e   : > { %303 = vperm.xlu1 %607, %v233_v27   ;;  %298 = vperm.xlu0 %606, %v232_v28  }
  0x2f   : > { %570 = vmatmul.msk.f32.gmra.mxu3 %vm316_vm0, %v217_v32 }
  0x30   : > { %308 = vperm.xlu2 %608, %v234_v33  }
  0x36   : > { %313 = vperm.xlu0 %606, %v235_v34  }
  0x6a   : > { %v259_v37 = vpop.permute.xlu2 %258 }
  0x72   : > { %v264_v40 = vpop.permute.xlu2 %263 }
  0x7a   : > { %v279_v47 = vpop.permute.xlu2 %278 }
  0x80   : > { %v249_v35 = vpop.permute.xlu1 %248  ;;  %v239_v36 = vpop.permute.xlu0 %238 }
  0x82   : > { %v294_v62 = vpop.permute.xlu2 %293 }
  0x88   : > { %v254_v38 = vpop.permute.xlu1 %253  ;;  %v244_v39 = vpop.permute.xlu0 %243 }
  0x8a   : > { %v309_v15 = vpop.permute.xlu2 %308 }
  0x90   : > { %v274_v41 = vpop.permute.xlu1 %273  ;;  %v269_v42 = vpop.permute.xlu0 %268 }
  0x91   : > { %v382_v43 = vpop.f32.mrf.mxu0 }
  0x92   : > { %v394_v44 = vpop.f32.mrf.mxu1  ;;  %v383_v45 = vadd.f32 %v382_v43, %v239_v36 }
  0x93   : > { %v395_v46 = vadd.f32 %v394_v44, %v259_v37 }
  0x94   : > { %v430_v48 = vpack.c.bf16 %v383_v45, %v383_v45 }
  0x95   : > { %v434_v49 = vpack.c.bf16 %v395_v46, %v395_v46 }
  0x96   : > { %447 = vst.msk [vmem:[%s794_s18] sm:$0xf] %vm446_vm1, %v430_v48 }
  0x97   : > { %451 = vst.msk [vmem:[%s794_s18 + $0x10] sm:$0xf] %vm446_vm1, %v434_v49 }
  0x98   : > { %v289_v50 = vpop.permute.xlu1 %288  ;;  %v284_v51 = vpop.permute.xlu0 %283 }
  0x99   : > { %v406_v52 = vpop.f32.mrf.mxu2  ;;  %v385_v55 = vpop.f32.mrf.mxu0 }
  0x9a   : > { %v418_v53 = vpop.f32.mrf.mxu3  ;;  %v407_v54 = vadd.f32 %v406_v52, %v279_v47  ;;  %v397_v56 = vpop.f32.mrf.mxu1  ;;  %v386_v57 = vadd.f32 %v385_v55, %v244_v39 }
  0x9b   : > { %v398_v58 = vadd.f32 %v397_v56, %v264_v40 }
  0x9c   : > { %v438_v59 = vpack.c.bf16 %v407_v54, %v407_v54  ;;  %v431_v60 = vpack.c.bf16 %v386_v57, %v386_v57 }
  0x9d   : > { %v435_v61 = vpack.c.bf16 %v398_v58, %v398_v58 }
  0x9e   : > { %455 = vst.msk [vmem:[%s794_s18 + $0x20] sm:$0xf] %vm446_vm1, %v438_v59 }
  0x9f   : > { %448 = vst.msk [vmem:[%s794_s18 + $0x4] sm:$0xf] %vm446_vm1, %v431_v60 }
  0xa0   : > { %v299_v63 = vpop.permute.xlu0 %298  ;;  %v304_v0 = vpop.permute.xlu1 %303  ;;  %452 = vst.msk [vmem:[%s794_s18 + $0x14] sm:$0xf] %vm446_vm1, %v435_v61 }
  0xa1   : > { %v419_v1 = vadd.f32 %v418_v53, %v299_v63  ;;  %v409_v3 = vpop.f32.mrf.mxu2  ;;  %v388_v7 = vpop.f32.mrf.mxu0 }
  0xa2   : > { %v421_v4 = vpop.f32.mrf.mxu3  ;;  %v410_v5 = vadd.f32 %v409_v3, %v284_v51  ;;  %v400_v8 = vpop.f32.mrf.mxu1  ;;  %v389_v9 = vadd.f32 %v388_v7, %v249_v35 }
  0xa3   : > { %v442_v2 = vpack.c.bf16 %v419_v1, %v419_v1  ;;  %v422_v6 = vadd.f32 %v421_v4, %v304_v0  ;;  %v401_v10 = vadd.f32 %v400_v8, %v269_v42 }
  0xa4   : > { %v439_v11 = vpack.c.bf16 %v410_v5, %v410_v5  ;;  %v432_v13 = vpack.c.bf16 %v389_v9, %v389_v9 }
  0xa5   : > { %459 = vst.msk [vmem:[%s794_s18 + $0x30] sm:$0xf] %vm446_vm1, %v442_v2  ;;  %v443_v12 = vpack.c.bf16 %v422_v6, %v422_v6  ;;  %v436_v14 = vpack.c.bf16 %v401_v10, %v401_v10 }
  0xa6   : > { %456 = vst.msk [vmem:[%s794_s18 + $0x24] sm:$0xf] %vm446_vm1, %v439_v11 }
  0xa7   : > { %460 = vst.msk [vmem:[%s794_s18 + $0x34] sm:$0xf] %vm446_vm1, %v443_v12 }
  0xa8   : > { %449 = vst.msk [vmem:[%s794_s18 + $0x8] sm:$0xf] %vm446_vm1, %v432_v13  ;;  %v314_v28 = vpop.permute.xlu0 %313 }
  0xa9   : > { %453 = vst.msk [vmem:[%s794_s18 + $0x18] sm:$0xf] %vm446_vm1, %v436_v14  ;;  %v412_v16 = vpop.f32.mrf.mxu2  ;;  %v391_v20 = vpop.f32.mrf.mxu0 }
  0xaa   : > { %v424_v17 = vpop.f32.mrf.mxu3  ;;  %v413_v18 = vadd.f32 %v412_v16, %v289_v50  ;;  %v403_v21 = vpop.f32.mrf.mxu1  ;;  %v392_v22 = vadd.f32 %v391_v20, %v254_v38 }
  0xab   : > { %v425_v19 = vadd.f32 %v424_v17, %v309_v15  ;;  %v404_v23 = vadd.f32 %v403_v21, %v274_v41 }
  0xac   : > { %v440_v24 = vpack.c.bf16 %v413_v18, %v413_v18  ;;  %v433_v26 = vpack.c.bf16 %v392_v22, %v392_v22 }
  0xad   : > { %v444_v25 = vpack.c.bf16 %v425_v19, %v425_v19  ;;  %v437_v27 = vpack.c.bf16 %v404_v23, %v404_v23 }
  0xae   : > { %457 = vst.msk [vmem:[%s794_s18 + $0x28] sm:$0xf] %vm446_vm1, %v440_v24 }
  0xaf   : > { %461 = vst.msk [vmem:[%s794_s18 + $0x38] sm:$0xf] %vm446_vm1, %v444_v25 }
  0xb0   : > { %450 = vst.msk [vmem:[%s794_s18 + $0xc] sm:$0xf] %vm446_vm1, %v433_v26 }
  0xb1   : > { %454 = vst.msk [vmem:[%s794_s18 + $0x1c] sm:$0xf] %vm446_vm1, %v437_v27  ;;  %v415_v29 = vpop.f32.mrf.mxu2 }
  0xb2   : > { %v427_v30 = vpop.f32.mrf.mxu3  ;;  %v416_v31 = vadd.f32 %v415_v29, %v294_v62 }
  0xb3   : > { %v428_v32 = vadd.f32 %v427_v30, %v314_v28 }
  0xb4   : > { %v441_v33 = vpack.c.bf16 %v416_v31, %v416_v31 }
  0xb5   : > { %v445_v34 = vpack.c.bf16 %v428_v32, %v428_v32 }
  0xb6   : > { %458 = vst.msk [vmem:[%s794_s18 + $0x2c] sm:$0xf] %vm446_vm1, %v441_v33 }
  0xb7   : > { %462 = vst.msk [vmem:[%s794_s18 + $0x3c] sm:$0xf] %vm446_vm1, %v445_v34 }
  0xb8 PF: > { %s13_s14 = sadd.s32 1, %s631_s14   ;;  %s841_s12 = smov %s627_s13 }
  0xb9   : > { %p10_p5 = scmp.ge.s32.totalorder %s13_s14, 4   ;;  %s842_s13 = smov %s844_s15 }
  0xbb   :  { %12 = sbr.rel (!%p10_p5) target bundleno = 2 (0x2), region = 62 }

// kernel: ms_nonlocal2d.5
= control target key start
LH: loop header
LB: loop body
LE: loop exit
PB: predicated region body
PF: predicated region fallthrough
CT: control target
= control target key end

     0   :  { %s461_s12 = smov 0   ;;  %s463_s13 = smov 0   ;;  %s525_s0 = inlined_call_operand.vmem [shape: f32[32,16], index: 0, kind: input, shape index: {}]   ;;  %s526_s1 = inlined_call_operand.vmem [shape: f32[32,1], index: 1, kind: input, shape index: {}]   ;;  %s527_s2 = inlined_call_operand.vmem [shape: f32[2,16,64], index: 2, kind: input, shape index: {}]   ;;  %s528_s3 = inlined_call_operand.vmem [shape: bf16[2,32,64], index: 3, kind: output, shape index: {}]  }
   0x1   :  { %s465_s14 = smov 0  }
   0x2 LB: > { %s25_s15 = sadd.s32 1, %s434_s13  ;;  %p370_p0 = scmp.ge.s32.totalorder %s438_s14, 1  ;;  %s438_s14 = sphi %s465_s14, %s13_s14   ;;  %s434_s13 = sphi %s463_s13, %s530_s13   ;;  %s430_s12 = sphi %s461_s12, %s529_s12  }
   0x3   : > { %p27_p1 = scmp.ge.s32.totalorder %s25_s15, 2  ;;  %p156_p2 = scmp.lt.s32.totalorder %s438_s14, 3 }
   0x5   : > { %s532_s15 = smov (%p27_p1, %s25_s15), 0  ;;  %p157_p3 = pnand %p370_p0, %p156_p2 }
   0x6   : > { %p186_p4 = scmp.lt.s32.totalorder (!%p157_p3), %s430_s12, 1 }
   0x7   : > { %160 = sbr.rel (%p157_p3) target bundleno = 159 (0x9f), region = 32 }
   0xc   : > { %v440_v0 = vmov 0   ;;  %v210_v1 = vld [vmem:[%s526_s1 + $0x10] sm:$0xff]  ;;  %v208_v2 = vld [vmem:[%s526_s1] sm:$0xff]  ;;  %s534_s12 = smov (!%p186_p4, %s430_s12), 1  ;;  %vm232_vm0 = vcmask 130048   ;;  %v203_v6 = vld [vmem:[%s525_s0 + $0x8] sm:$0xff] }
   0xd   : > { %415 = vset.pattern.permute.xlu1 %v440_v0  ;;  %414 = vset.pattern.permute.xlu0 %v440_v0  ;;  %s381_s20 = sshll.u32 %s534_s12, 4  ;;  %v202_v5 = vld [vmem:[%s525_s0] sm:$0xff]  ;;  %v204_v7 = vld [vmem:[%s525_s0 + $0x10] sm:$0xff]  ;;  %v205_v8 = vld [vmem:[%s525_s0 + $0x18] sm:$0xff]  ;;  %vm278_vm1 = vcmask 519168  }
   0xe   : > { %224 = vperm.xlu1 %415, %v210_v1   ;;  %214 = vperm.xlu0 %414, %v208_v2   ;;  %s193_s23 = scalar_lea.vmem %s527_s2, %s381_s20  ;;  %v211_v9 = vld [vmem:[%s526_s1 + $0x18] sm:$0xff]  ;;  %v209_v10 = vld [vmem:[%s526_s1 + $0x8] sm:$0xff]  ;;  %s201_s11 = scalar_lea.vmem %s528_s3, %s381_s20 }
   0xf   : > { %v207_v3 = vld [vmem:[%s193_s23 + $0x8] sm:$0xff]  ;;  %v206_v4 = vld [vmem:[%s193_s23] sm:$0xff] }
  0x10   : > { %259 = vmatpush.msra.mxu0 %v207_v3  ;;  %383 = vmatpush.msra.mxu1 %v207_v3 }
  0x11   : > { %384 = vmatpush.msra.mxu2 %v207_v3  ;;  %385 = vmatpush.msra.mxu3 %v207_v3 }
  0x12   : > { %260 = vmatpush.msra.mxu0 %v206_v4  ;;  %386 = vmatpush.msra.mxu1 %v206_v4 }
  0x13   : > { %387 = vmatpush.msra.mxu2 %v206_v4  ;;  %388 = vmatpush.msra.mxu3 %v206_v4 }
  0x14   : > { %375 = vmatmul.msk.f32.vlgmr.msra.gmra.mxu0 %vm232_vm0, %v202_v5  ;;  %376 = vmatmul.msk.f32.vlgmr.msra.gmra.mxu1 %vm232_vm0, %v203_v6 }
  0x15   : > { %377 = vmatmul.msk.f32.vlgmr.msra.gmra.mxu2 %vm232_vm0, %v204_v7  ;;  %378 = vmatmul.msk.f32.vlgmr.msra.gmra.mxu3 %vm232_vm0, %v205_v8 }
  0x16   : > { %229 = vperm.xlu1 %415, %v211_v9   ;;  %219 = vperm.xlu0 %414, %v209_v10  }
  0x80   : > { %v215_v11 = vpop.permute.xlu0 %214  ;;  %v225_v12 = vpop.permute.xlu1 %224 }
  0x88   : > { %v220_v13 = vpop.permute.xlu0 %219  ;;  %v230_v20 = vpop.permute.xlu1 %229 }
  0x91   : > { %v262_v14 = vpop.f32.mrf.mxu0  ;;  %v265_v15 = vpop.f32.mrf.mxu1 }
  0x92   : > { %v263_v16 = vadd.f32 %v262_v14, %v215_v11  ;;  %v266_v17 = vadd.f32 %v265_v15, %v220_v13 }
  0x94   : > { %v274_v18 = vpack.c.bf16 %v263_v16, %v263_v16  ;;  %v275_v19 = vpack.c.bf16 %v266_v17, %v266_v17 }
  0x96   : > { %279 = vst.msk [vmem:[%s201_s11] sm:$0xf] %vm278_vm1, %v274_v18 }
  0x97   : > { %280 = vst.msk [vmem:[%s201_s11 + $0x4] sm:$0xf] %vm278_vm1, %v275_v19 }
  0x98   : > { %v268_v21 = vpop.f32.mrf.mxu2  ;;  %v271_v22 = vpop.f32.mrf.mxu3 }
  0x99   : > { %v269_v23 = vadd.f32 %v268_v21, %v225_v12  ;;  %v272_v24 = vadd.f32 %v271_v22, %v230_v20 }
  0x9b   : > { %v276_v25 = vpack.c.bf16 %v269_v23, %v269_v23  ;;  %v277_v26 = vpack.c.bf16 %v272_v24, %v272_v24 }
  0x9d   : > { %281 = vst.msk [vmem:[%s201_s11 + $0x8] sm:$0xf] %vm278_vm1, %v276_v25 }
  0x9e   : > { %282 = vst.msk [vmem:[%s201_s11 + $0xc] sm:$0xf] %vm278_vm1, %v277_v26 }
  0x9f PF: > { %s13_s14 = sadd.s32 1, %s438_s14   ;;  %s529_s12 = smov %s434_s13 }
  0xa0   : > { %p10_p5 = scmp.ge.s32.totalorder %s13_s14, 4   ;;  %s530_s13 = smov %s532_s15 }
  0xa2   :  { %12 = sbr.rel (!%p10_p5) target bundleno = 2 (0x2), region = 62 }

// kernel: ms_nonlocal2d.7
= control target key start
LH: loop header
LB: loop body
LE: loop exit
PB: predicated region body
PF: predicated region fallthrough
CT: control target
= control target key end

     0   :  { %s2701_s0 = inlined_call_operand.vmem [shape: bf16[2,8,256], index: 0, kind: input, shape index: {}]   ;;  %s2702_s1 = inlined_call_operand.vmem [shape: bf16[2,8,256], index: 1, kind: input, shape index: {}]   ;;  %s2703_s2 = inlined_call_operand.vmem [shape: bf16[2,8,256], index: 2, kind: input, shape index: {}]   ;;  %s2704_s3 = inlined_call_operand.vmem [shape: bf16[2,8,256], index: 3, kind: input, shape index: {}]   ;;  %s2705_s4 = inlined_call_operand.vmem [shape: bf16[2,8,256], index: 4, kind: input, shape index: {}]   ;;  %s2706_s5 = inlined_call_operand.vmem [shape: f32[16,8], index: 5, kind: input, shape index: {}]   ;;  %s2707_s6 = inlined_call_operand.vmem [shape: f32[16,1], index: 6, kind: input, shape index: {}]   ;;  %s2708_s7 = inlined_call_operand.vmem [shape: f32[2,16,256], index: 7, kind: input, shape index: {}]   ;;  %s2709_s8 = inlined_call_operand.vmem [shape: f32[2,16,256], index: 8, kind: output, shape index: {}]  }
   0x1   :  { %2716 = sst [smem:[#allocation16_spill]] %s2704_s3 }
   0x2   :  { %2717 = sst [smem:[#allocation17_spill]] %s2708_s7 }
   0x3   :  { %s2088_s27 = smov 0   ;;  %s2090_s28 = smov 0  }
   0x4   :  { %s2092_s29 = smov 0   ;;  %s2094_s30 = smov 0  }
   0x5   :  { %s2096_s9 = smov 0   ;;  %s2098_s10 = smov 0  }
   0x6   :  { %s2100_s11 = smov 0   ;;  %s2102_s12 = smov 0  }
   0x7   :  { %s2104_s13 = smov 0  }
   0x8 LB: > { %2718 = sst [smem:[#allocation8_spill]] %s2009_s28  ;;  %s30_s14 = sadd.s32 1, %s2025_s10  ;;  %s2037_s13 = sphi %s2104_s13, %s18_s13   ;;  %s2033_s12 = sphi %s2102_s12, %s2737_s12   ;;  %s2029_s11 = sphi %s2100_s11, %s2736_s11   ;;  %s2025_s10 = sphi %s2098_s10, %s2735_s10   ;;  %s2021_s9 = sphi %s2096_s9, %s2734_s9   ;;  %s2017_s30 = sphi %s2094_s30, %s2733_s30   ;;  %s2013_s29 = sphi %s2092_s29, %s2732_s29   ;;  %s2009_s28 = sphi %s2090_s28, %s2731_s28   ;;  %s2005_s27 = sphi %s2088_s27, %s2730_s27  }
   0x9   : > { %2719 = sst [smem:[#allocation9_spill]] %s2025_s10  ;;  %p31_p0 = scmp.ge.s32.totalorder %s30_s14, 2 }
   0xa   : > { %2720 = sst [smem:[#allocation10_spill]] %s2029_s11  ;;  %s33_s15 = sadd.s32 1, %s2029_s11 }
   0xb   : > { %2721 = sst [smem:[#allocation11_spill]] %s2033_s12  ;;  %s1713_s16 = sadd.s32 4294967295, %s2037_s13  }
   0xc   : > { %s37_s17 = sadd.s32 1, %s2033_s12  ;;  %s2739_s14 = smov (%p31_p0, %s30_s14), 0 }
   0xd   : > { %2722 = sst [smem:[#allocation12_spill]] %s2739_s14  ;;  %s2741_s15 = smov (!%p31_p0, %s33_s15), %s2029_s11 }
   0xe   : > { %p231_p1 = scmp.ne.s32.totalorder %s2009_s28, %s2005_s27  ;;  %p232_p2 = scmp.eq.s32.totalorder %s2037_s13, 0 }
   0xf   : > { %p35_p3 = scmp.ge.s32.totalorder %s2741_s15, 2  ;;  %p263_p4 = scmp.eq.s32.totalorder %s1713_s16, 7 }
  0x10   : > { %p2143_p5 = por %p232_p2, %p231_p1  ;;  %s224_s23 = sadd.s32 1, %s2009_s28 }
  0x11   : > { %s2743_s15 = smov (%p35_p3, %s2741_s15), 0  ;;  %s2745_s17 = smov (!%p35_p3, %s37_s17), %s2033_s12 }
  0x12   : > { %2724 = sst [smem:[#allocation13_spill]] %s2743_s15  ;;  %p2150_p6 = por %p263_p4, %p231_p1 }
  0x13   : > { %p39_p7 = scmp.ge.s32.totalorder %s2745_s17, 2  ;;  %s220_s20 = ssub.s32 %s2029_s11, %s2743_s15 }
  0x14   : > { %p1716_p9 = scmp.ge.s32.totalorder %s2037_s13, 8 }
  0x15   : > { %s2747_s17 = smov (%p39_p7, %s2745_s17), 0 }
  0x16   : > { %2726 = sst [smem:[#allocation14_spill]] %s2747_s17  ;;  %s219_s21 = ssub.s32 %s2033_s12, %s2747_s17 }
  0x17   : > { %s221_s22 = sor.u32 %s220_s20, %s219_s21 }
  0x18   : > { %p222_p8 = scmp.eq.s32.totalorder %s221_s22, 0  ;;  %291 = sbr.rel (%p1716_p9) target bundleno = 41 (0x29), region = 24 }
  0x1a   : > { %s2162_s24 = scalar_select %p222_p8, %s2009_s28, %s224_s23  }
  0x1c   : > { %2727 = sst [smem:[#allocation15_spill]] %s2162_s24 }
  0x1d   : > { %343 = sbr.rel (!%p2143_p5) target bundleno = 41 (0x29), region = 48  ;;  %s345_s25 = sand.u32 (%p2143_p5), 1, %s2009_s28  }
  0x1e   : > { %s1718_s26 = sshll.u32 (%p2143_p5), %s2033_s12, 2  ;;  %s1717_s16 = sshll.u32 (%p2143_p5), %s345_s25, 4 }
  0x1f   : > { %s349_s15 = sadd.s32 (%p2143_p5), %s2029_s11, %s1718_s26  ;;  %s2728_s7 = sld [smem:[#allocation17_spill]] (%p2143_p5) }
  0x20   : > { %s1719_s14 = sshll.u32 (%p2143_p5), %s349_s15, 3  ;;  %s347_s22 = scalar_lea.vmem (%p2143_p5), [#allocation6], %s1717_s16 }
  0x25   : > { %s351_s21 = scalar_lea.vmem %s2728_s7, %s1719_s14 }
  0x26   : > { %v382_v0 = vld [vmem:[%s351_s21] sm:$0xff]  ;;  %v384_v1 = vld [vmem:[%s351_s21 + $0x10] sm:$0xff] }
  0x27   : > { %383 = vst [vmem:[%s347_s22] sm:$0xff] %v382_v0 }
  0x28   : > { %385 = vst [vmem:[%s347_s22 + $0x8] sm:$0xff] %v384_v1 }
  0x29 PF: > { %p1720_p10 = scmp.ge.s32.totalorder %s2037_s13, 1  ;;  %p390_p11 = scmp.lt.s32.totalorder %s2037_s13, 9 }
  0x2b   : > { %p391_p12 = pnand %p1720_p10, %p390_p11 }
  0x2c   : > { %s397_s15 = sand.u32 (!%p391_p12), 1, %s2005_s27   ;;  %p463_p13 = scmp.lt.s32.totalorder (!%p391_p12), %s2021_s9, 1 }
  0x2d   : > { %394 = sbr.rel (%p391_p12) target bundleno = 1286 (0x506), region = 86  ;;  %s2177_s14 = sshll.u32 (!%p391_p12), %s397_s15, 4 }
  0x2e   : > { %p465_p0 = scmp.lt.s32.totalorder (!%p391_p12), %s2017_s30, 1  ;;  %s2729_s3 = sld [smem:[#allocation16_spill]] (!%p391_p12) }
  0x2f   : > { %s399_s20 = scalar_lea.vmem (!%p391_p12), [#allocation6], %s2177_s14  ;;  %p1733_p1 = scmp.ne.s32.totalorder (!%p391_p12), %s2013_s29, 0 }
  0x32   : > { %s464_s17 = scalar_select %p463_p13, %s2021_s9, 1 }
  0x33   : > { %s466_s18 = scalar_select %p465_p0, %s2017_s30, 1 }
  0x34   : > { %s1723_s23 = sshll.u32 %s464_s17, 1  ;;  %s1769_s25 = sshll.u32 %s464_s17, 3 }
  0x35   : > { %s468_s26 = sadd.s32 %s1723_s23, %s466_s18  ;;  %s2185_s21 = scalar_lea.vmem %s2729_s3, %s1769_s25 }
  0x36   : > { %s1724_s22 = sshll.u32 %s468_s26, 2  ;;  %s2190_s27 = scalar_lea.vmem %s2705_s4, %s1769_s25 }
  0x37   : > { %s470_s10 = scalar_lea.vmem %s2701_s0, %s1724_s22  ;;  %s478_s17 = scalar_lea.vmem %s2702_s1, %s1724_s22 }
  0x38   : > { %s486_s16 = scalar_lea.vmem %s2703_s2, %s1724_s22  ;;  %s2203_s3 = scalar_lea.vmem [#allocation7], %s2177_s14 }
  0x39   : > { %501 = sbr.rel (%p1733_p1) target bundleno = 112 (0x70), region = 94 }
  0x3e   : > { %v502_v2 = vld [vmem:[%s470_s10] sm:$0xf]  ;;  %vm512_vm0 = vcmask 7168   ;;  %v2039_v9 = vmov -inf   ;;  %v2040_v12 = vmov 0.0   ;;  %vm545_vm1 = vcmask 64512  }
  0x3f   : > { %v504_v3 = vld [vmem:[%s478_s17] sm:$0xf]  ;;  %v503_v5 = vunpack.c.l.bf16 %v502_v2  ;;  %513 = vst.msk [vmem:[#allocation3] sm:$0xff] %vm512_vm0, %v2039_v9 }
  0x40   : > { %v507_v4 = vld [vmem:[%s486_s16] sm:$0xf]  ;;  %v505_v6 = vunpack.c.l.bf16 %v504_v3  ;;  %514 = vst.msk [vmem:[#allocation3 + $0x8] sm:$0xff] %vm512_vm0, %v2039_v9 }
  0x41   : > { %v508_v7 = vunpack.c.l.bf16 %v507_v4  ;;  %515 = vst.msk [vmem:[#allocation3 + $0x10] sm:$0xff] %vm512_vm0, %v2039_v9 }
  0x42   : > { %v506_v8 = vadd.f32 %v505_v6, %v503_v5  ;;  %516 = vst.msk [vmem:[#allocation3 + $0x18] sm:$0xff] %vm512_vm0, %v2039_v9 }
  0x43   : > { %517 = vst.msk [vmem:[#allocation3 + $0x20] sm:$0xff] %vm512_vm0, %v2039_v9 }
  0x44   : > { %v509_v10 = vadd.f32 %v508_v7, %v506_v8  ;;  %518 = vst.msk [vmem:[#allocation3 + $0x28] sm:$0xff] %vm512_vm0, %v2039_v9 }
  0x45   : > { %519 = vst.msk [vmem:[#allocation3 + $0x30] sm:$0xff] %vm512_vm0, %v2039_v9 }
  0x46   : > { %v510_v11 = vpack.c.bf16 %v509_v10, %v509_v10  ;;  %520 = vst.msk [vmem:[#allocation3 + $0x38] sm:$0xff] %vm512_vm0, %v2039_v9 }
  0x47   : > { %521 = vst.msk [vmem:[#allocation3 + $0x40] sm:$0xff] %vm512_vm0, %v2039_v9 }
  0x48   : > { %511 = vst [vmem:[#allocation2] sm:$0xf] %v510_v11 }
  0x49   : > { %522 = vst.msk [vmem:[#allocation3 + $0x48] sm:$0xff] %vm512_vm0, %v2039_v9 }
  0x4a   : > { %523 = vst.msk [vmem:[#allocation3 + $0x50] sm:$0xff] %vm512_vm0, %v2039_v9 }
  0x4b   : > { %524 = vst.msk [vmem:[#allocation3 + $0x58] sm:$0xff] %vm512_vm0, %v2039_v9 }
  0x4c   : > { %525 = vst.msk [vmem:[#allocation3 + $0x60] sm:$0xff] %vm512_vm0, %v2039_v9 }
  0x4d   : > { %526 = vst.msk [vmem:[#allocation3 + $0x68] sm:$0xff] %vm512_vm0, %v2039_v9 }
  0x4e   : > { %527 = vst.msk [vmem:[#allocation3 + $0x70] sm:$0xff] %vm512_vm0, %v2039_v9 }
  0x4f   : > { %528 = vst.msk [vmem:[#allocation3 + $0x78] sm:$0xff] %vm512_vm0, %v2039_v9 }
  0x50   : > { %529 = vst.msk [vmem:[#allocation4] sm:$0xff] %vm512_vm0, %v2040_v12 }
  0x51   : > { %530 = vst.msk [vmem:[#allocation4 + $0x8] sm:$0xff] %vm512_vm0, %v2040_v12 }
  0x52   : > { %531 = vst.msk [vmem:[#allocation4 + $0x10] sm:$0xff] %vm512_vm0, %v2040_v12 }
  0x53   : > { %532 = vst.msk [vmem:[#allocation4 + $0x18] sm:$0xff] %vm512_vm0, %v2040_v12 }
  0x54   : > { %533 = vst.msk [vmem:[#allocation4 + $0x20] sm:$0xff] %vm512_vm0, %v2040_v12 }
  0x55   : > { %534 = vst.msk [vmem:[#allocation4 + $0x28] sm:$0xff] %vm512_vm0, %v2040_v12 }
  0x56   : > { %535 = vst.msk [vmem:[#allocation4 + $0x30] sm:$0xff] %vm512_vm0, %v2040_v12 }
  0x57   : > { %536 = vst.msk [vmem:[#allocation4 + $0x38] sm:$0xff] %vm512_vm0, %v2040_v12 }
  0x58   : > { %537 = vst.msk [vmem:[#allocation4 + $0x40] sm:$0xff] %vm512_vm0, %v2040_v12 }
  0x59   : > { %538 = vst.msk [vmem:[#allocation4 + $0x48] sm:$0xff] %vm512_vm0, %v2040_v12 }
  0x5a   : > { %539 = vst.msk [vmem:[#allocation4 + $0x50] sm:$0xff] %vm512_vm0, %v2040_v12 }
  0x5b   : > { %540 = vst.msk [vmem:[#allocation4 + $0x58] sm:$0xff] %vm512_vm0, %v2040_v12 }
  0x5c   : > { %541 = vst.msk [vmem:[#allocation4 + $0x60] sm:$0xff] %vm512_vm0, %v2040_v12 }
  0x5d   : > { %542 = vst.msk [vmem:[#allocation4 + $0x68] sm:$0xff] %vm512_vm0, %v2040_v12 }
  0x5e   : > { %543 = vst.msk [vmem:[#allocation4 + $0x70] sm:$0xff] %vm512_vm0, %v2040_v12 }
  0x5f   : > { %544 = vst.msk [vmem:[#allocation4 + $0x78] sm:$0xff] %vm512_vm0, %v2040_v12 }
  0x60   : > { %546 = vst.msk [vmem:[#allocation5] sm:$0xff] %vm545_vm1, %v2040_v12 }
  0x61   : > { %547 = vst.msk [vmem:[#allocation5 + $0x8] sm:$0xff] %vm545_vm1, %v2040_v12 }
  0x62   : > { %548 = vst.msk [vmem:[#allocation5 + $0x10] sm:$0xff] %vm545_vm1, %v2040_v12 }
  0x63   : > { %549 = vst.msk [vmem:[#allocation5 + $0x18] sm:$0xff] %vm545_vm1, %v2040_v12 }
  0x64   : > { %550 = vst.msk [vmem:[#allocation5 + $0x20] sm:$0xff] %vm545_vm1, %v2040_v12 }
  0x65   : > { %551 = vst.msk [vmem:[#allocation5 + $0x28] sm:$0xff] %vm545_vm1, %v2040_v12 }
  0x66   : > { %552 = vst.msk [vmem:[#allocation5 + $0x30] sm:$0xff] %vm545_vm1, %v2040_v12 }
  0x67   : > { %553 = vst.msk [vmem:[#allocation5 + $0x38] sm:$0xff] %vm545_vm1, %v2040_v12 }
  0x68   : > { %554 = vst.msk [vmem:[#allocation5 + $0x40] sm:$0xff] %vm545_vm1, %v2040_v12 }
  0x69   : > { %555 = vst.msk [vmem:[#allocation5 + $0x48] sm:$0xff] %vm545_vm1, %v2040_v12 }
  0x6a   : > { %556 = vst.msk [vmem:[#allocation5 + $0x50] sm:$0xff] %vm545_vm1, %v2040_v12 }
  0x6b   : > { %557 = vst.msk [vmem:[#allocation5 + $0x58] sm:$0xff] %vm545_vm1, %v2040_v12 }
  0x6c   : > { %558 = vst.msk [vmem:[#allocation5 + $0x60] sm:$0xff] %vm545_vm1, %v2040_v12 }
  0x6d   : > { %559 = vst.msk [vmem:[#allocation5 + $0x68] sm:$0xff] %vm545_vm1, %v2040_v12 }
  0x6e   : > { %560 = vst.msk [vmem:[#allocation5 + $0x70] sm:$0xff] %vm545_vm1, %v2040_v12 }
  0x6f   : > { %561 = vst.msk [vmem:[#allocation5 + $0x78] sm:$0xff] %vm545_vm1, %v2040_v12 }
  0x70 PF: > { %v571_v13 = vld [vmem:[#allocation2] sm:$0xf]  ;;  %s1734_s7 = sshll.u32 %s2013_s29, 7  ;;  %vm613_vm2 = vcmask 1043456   ;;  %vm588_vm3 = vcmask 64512   ;;  %v2041_v38 = vmov 0  }
  0x71   : > { %572 = vxpose.xlu0.c.b16.start.end [1/1] (short) %v571_v13, 128  ;;  %s2255_s28 = sshra.s32 %s1734_s7, 7  ;;  %1865 = vset.pattern.permute.xlu2 %v2041_v38  ;;  %v2311_v39 = vld [vmem:[#allocation3] sm:$0xff]  ;;  %vm1034_vm4 = vcmask 7168   ;;  %v2323_v44 = vld [vmem:[#allocation3 + $0x8] sm:$0xff]  ;;  %v668_v49 = vld [vmem:[#allocation3 + $0x10] sm:$0xff]  ;;  %p1745_p2 = scmp.ne.s32.totalorder %s2013_s29, 1 }
  0x72   : > { %s1735_s10 = sshll.u32 %s2255_s28, 2  ;;  %1866 = vset.pattern.permute.xlu1 %v2041_v38  ;;  %v2336_v54 = vld [vmem:[#allocation3 + $0x18] sm:$0xff]  ;;  %v2347_v58 = vld [vmem:[#allocation3 + $0x20] sm:$0xff]  ;;  %v2357_v62 = vld [vmem:[#allocation3 + $0x28] sm:$0xff] }
  0x73   : > { %s566_s11 = scalar_lea.vmem %s2185_s21, %s1735_s10  ;;  %v2364_v1 = vld [vmem:[#allocation3 + $0x30] sm:$0xff]  ;;  %v2373_v5 = vld [vmem:[#allocation3 + $0x38] sm:$0xff]  ;;  %v2380_v8 = vld [vmem:[#allocation3 + $0x40] sm:$0xff]  ;;  %s569_s12 = scalar_lea.vmem %s2190_s27, %s1735_s10 }
  0x74   : > { %v567_v14 = vld [vmem:[%s566_s11] sm:$0xf]  ;;  %v675_v12 = vld [vmem:[#allocation3 + $0x48] sm:$0xff] }
  0x75   : > { %v615_v15 = vsel %vm613_vm2, %v567_v14, 0 }
  0x76   : > { %624 = vmatpush.bf16.msra.mxu0 %v615_v15  ;;  %1771 = vmatpush.bf16.msra.mxu3 %v615_v15 }
  0xd8   : > { %1867 = vset.pattern.permute.xlu0 %v2041_v38 }
 0x11d   : > { %v580_v16 = vpop.trf.xlu0 }
 0x11e   : > { %1737 = vmatmul.msk.bf16.vlgmr.msra.gmra.mxu0 %vm588_vm3, %v580_v16 }
 0x12d   : > { %v581_v17 = vpop.trf.xlu0 }
 0x12e   : > { %1738 = vmatmul.msk.bf16.gmra.mxu0 %vm588_vm3, %v581_v17  ;;  %v2392_v17 = vld [vmem:[#allocation3 + $0x50] sm:$0xff] }
 0x13d   : > { %v582_v18 = vpop.trf.xlu0 }
 0x13e   : > { %1739 = vmatmul.msk.bf16.gmra.mxu0 %vm588_vm3, %v582_v18 }
 0x14d   : > { %v583_v19 = vpop.trf.xlu0 }
 0x14e   : > { %1740 = vmatmul.msk.bf16.gmra.mxu0 %vm588_vm3, %v583_v19 }
 0x15d   : > { %v584_v20 = vpop.trf.xlu0 }
 0x15e   : > { %1741 = vmatmul.msk.bf16.gmra.mxu0 %vm588_vm3, %v584_v20 }
 0x16d   : > { %v585_v21 = vpop.trf.xlu0 }
 0x16e   : > { %1742 = vmatmul.msk.bf16.vlgmr.msra.gmra.mxu3 %vm588_vm3, %v585_v21 }
 0x17d   : > { %v586_v22 = vpop.trf.xlu0 }
 0x17e   : > { %1743 = vmatmul.msk.bf16.gmra.mxu3 %vm588_vm3, %v586_v22  ;;  %v2405_v22 = vld [vmem:[#allocation3 + $0x58] sm:$0xff] }
 0x18d   : > { %v587_v23 = vpop.trf.xlu0 }
 0x18e   : > { %1744 = vmatmul.msk.bf16.gmra.mxu3 %vm588_vm3, %v587_v23 }
 0x19b   : > { %v2269_v24 = vpop.f32.mrf.mxu0 }
 0x19c   : > { %682 = vmax.xlane.f32.xlu0 %v2269_v24 }
 0x1a3   : > { %v2272_v25 = vpop.f32.mrf.mxu0 }
 0x1a4   : > { %684 = vmax.xlane.f32.xlu1 %v2272_v25 }
 0x1ab   : > { %v2275_v26 = vpop.f32.mrf.mxu0 }
 0x1ac   : > { %686 = vmax.xlane.f32.xlu1 %v2275_v26 }
 0x1b3   : > { %v2278_v27 = vpop.f32.mrf.mxu0 }
 0x1b4   : > { %688 = vmax.xlane.f32.xlu2 %v2278_v27 }
 0x1bb   : > { %v2281_v28 = vpop.f32.mrf.mxu0 }
 0x1bc   : > { %690 = vmax.xlane.f32.xlu2 %v2281_v28 }
 0x1c3   : > { %v2284_v29 = vpop.f32.mrf.mxu0 }
 0x1c4   : > { %692 = vmax.xlane.f32.xlu1 %v2284_v29 }
 0x1cb   : > { %v2287_v30 = vpop.f32.mrf.mxu0 }
 0x1cc   : > { %694 = vmax.xlane.f32.xlu2 %v2287_v30 }
 0x1d3   : > { %v2290_v31 = vpop.f32.mrf.mxu0 }
 0x1d4   : > { %696 = vmax.xlane.f32.xlu1 %v2290_v31 }
 0x1db   : > { %v2293_v32 = vpop.f32.mrf.mxu0 }
 0x1dc   : > { %698 = vmax.xlane.f32.xlu2 %v2293_v32 }
 0x1e3   : > { %v2296_v33 = vpop.f32.mrf.mxu0 }
 0x1e4   : > { %700 = vmax.xlane.f32.xlu1 %v2296_v33 }
 0x1f1   : > { %v2299_v34 = vpop.f32.mrf.mxu3 }
 0x1f2   : > { %702 = vmax.xlane.f32.xlu2 %v2299_v34 }
 0x1f9   : > { %v2302_v35 = vpop.f32.mrf.mxu3 }
 0x1fa   : > { %704 = vmax.xlane.f32.xlu1 %v2302_v35 }
 0x201   : > { %v2305_v36 = vpop.f32.mrf.mxu3 }
 0x202   : > { %706 = vmax.xlane.f32.xlu2 %v2305_v36 }
 0x209   : > { %v2308_v37 = vpop.f32.mrf.mxu3 }
 0x20a   : > { %708 = vmax.xlane.f32.xlu1 %v2308_v37 }
 0x20f   : > { %v683_v40 = vpop.xlane.xlu0 %682 }
 0x210   : > { %v2314_v41 = vmax.f32 %v2311_v39, %v683_v40  ;;  %v678_v40 = vld [vmem:[#allocation3 + $0x60] sm:$0xff] }
 0x211   : > { %v2316_v42 = vpop.f32.mrf.mxu3 }
 0x212   : > { %710 = vmax.xlane.f32.xlu2 %v2316_v42  ;;  %v730_v43 = vsub.f32 %v2311_v39, %v2314_v41  ;;  %1244 = vst.msk [vmem:[#allocation3] sm:$0xff] %vm1034_vm4, %v2314_v41 }
 0x217   : > { %v685_v45 = vpop.xlane.xlu1 %684 }
 0x218   : > { %v2326_v46 = vmax.f32 %v2323_v44, %v685_v45 }
 0x219   : > { %v2328_v47 = vpop.f32.mrf.mxu3 }
 0x21a   : > { %v731_v48 = vsub.f32 %v2323_v44, %v2326_v46  ;;  %1245 = vst.msk [vmem:[#allocation3 + $0x8] sm:$0xff] %vm1034_vm4, %v2326_v46  ;;  %712 = vmax.xlane.f32.xlu1 %v2328_v47 }
 0x21f   : > { %v687_v50 = vpop.xlane.xlu1 %686 }
 0x220   : > { %v716_v51 = vmax.f32 %v668_v49, %v687_v50 }
 0x222   : > { %v732_v52 = vsub.f32 %v668_v49, %v716_v51  ;;  %1246 = vst.msk [vmem:[#allocation3 + $0x10] sm:$0xff] %vm1034_vm4, %v716_v51 }
 0x224   : > { %v750_v53 = vmul.f32 1.442695, %v732_v52  ;;  %v2415_v52 = vld [vmem:[#allocation3 + $0x68] sm:$0xff] }
 0x226   : > { %1868 = vpow2.f32 %v750_v53 }
 0x227   : > { %v689_v55 = vpop.xlane.xlu2 %688 }
 0x228   : > { %v2339_v56 = vmax.f32 %v2336_v54, %v689_v55 }
 0x22a   : > { %1247 = vst.msk [vmem:[#allocation3 + $0x18] sm:$0xff] %vm1034_vm4, %v2339_v56  ;;  %780 = vperm.xlu2 %1865, %v2314_v41  }
 0x22c   : > { %v2344_v57 = vpop.eup %1868 }
 0x22d   : > { %1128 = vperm.xlu0 %1867, %v2344_v57  }
 0x22f   : > { %v691_v59 = vpop.xlane.xlu2 %690 }
 0x230   : > { %v2350_v60 = vmax.f32 %v2347_v58, %v691_v59 }
 0x232   : > { %790 = vperm.xlu2 %1865, %v716_v51   ;;  %v734_v61 = vsub.f32 %v2347_v58, %v2350_v60  ;;  %1248 = vst.msk [vmem:[#allocation3 + $0x20] sm:$0xff] %vm1034_vm4, %v2350_v60  ;;  %v746_v58 = vmul.f32 1.442695, %v730_v43 }
 0x233   : > { %785 = vperm.xlu1 %1866, %v2326_v46  }
 0x234   : > { %v754_v44 = vmul.f32 1.442695, %v734_v61 }
 0x237   : > { %v693_v63 = vpop.xlane.xlu1 %692 }
 0x238   : > { %v2360_v0 = vmax.f32 %v2357_v62, %v693_v63 }
 0x23a   : > { %1249 = vst.msk [vmem:[#allocation3 + $0x28] sm:$0xff] %vm1034_vm4, %v2360_v0 }
 0x23f   : > { %v695_v2 = vpop.xlane.xlu2 %694 }
 0x240   : > { %v2367_v3 = vmax.f32 %v2364_v1, %v695_v2  ;;  %v2429_v2 = vld [vmem:[#allocation3 + $0x70] sm:$0xff] }
 0x242   : > { %v736_v4 = vsub.f32 %v2364_v1, %v2367_v3  ;;  %1250 = vst.msk [vmem:[#allocation3 + $0x30] sm:$0xff] %vm1034_vm4, %v2367_v3  ;;  %v735_v1 = vsub.f32 %v2357_v62, %v2360_v0 }
 0x247   : > { %v697_v6 = vpop.xlane.xlu1 %696 }
 0x248   : > { %v2376_v7 = vmax.f32 %v2373_v5, %v697_v6  ;;  %v748_v6 = vmul.f32 1.442695, %v731_v48 }
 0x24a   : > { %1251 = vst.msk [vmem:[#allocation3 + $0x38] sm:$0xff] %vm1034_vm4, %v2376_v7 }
 0x24f   : > { %v699_v9 = vpop.xlane.xlu2 %698 }
 0x250   : > { %v2383_v10 = vmax.f32 %v2380_v8, %v699_v9 }
 0x252   : > { %v738_v11 = vsub.f32 %v2380_v8, %v2383_v10  ;;  %1252 = vst.msk [vmem:[#allocation3 + $0x40] sm:$0xff] %vm1034_vm4, %v2383_v10  ;;  %820 = vperm.xlu2 %1865, %v2383_v10  }
 0x254   : > { %v762_v39 = vmul.f32 1.442695, %v738_v11 }
 0x257   : > { %v701_v13 = vpop.xlane.xlu1 %700 }
 0x258   : > { %v723_v14 = vmax.f32 %v675_v12, %v701_v13 }
 0x25a   : > { %v739_v15 = vsub.f32 %v675_v12, %v723_v14  ;;  %1253 = vst.msk [vmem:[#allocation3 + $0x48] sm:$0xff] %vm1034_vm4, %v723_v14  ;;  %825 = vperm.xlu1 %1866, %v723_v14   ;;  %v2443_v14 = vld [vmem:[#allocation3 + $0x78] sm:$0xff] }
 0x25c   : > { %v764_v16 = vmul.f32 1.442695, %v739_v15 }
 0x25e   : > { %1870 = vpow2.f32 %v764_v16  ;;  %v570_v16 = vld [vmem:[%s569_s12] sm:$0xf] }
 0x25f   : > { %1058 = vmatpush.bf16.xpose.msra.mxu1 %v570_v16  ;;  %1772 = vmatpush.bf16.xpose.msra.mxu2 %v570_v16 }
 0x262   : > { %800 = vperm.xlu1 %1866, %v2350_v60   ;;  %v758_v60 = vmul.f32 1.442695, %v736_v4 }
 0x264   : > { %v2394_v18 = vpop.eup %1870 }
 0x265   : > { %v703_v19 = vpop.xlane.xlu2 %702  ;;  %1163 = vperm.xlu0 %1867, %v2394_v18  }
 0x266   : > { %v2398_v20 = vmax.f32 %v2392_v17, %v703_v19 }
 0x268   : > { %v740_v21 = vsub.f32 %v2392_v17, %v2398_v20  ;;  %1254 = vst.msk [vmem:[#allocation3 + $0x50] sm:$0xff] %vm1034_vm4, %v2398_v20  ;;  %830 = vperm.xlu2 %1865, %v2398_v20  }
 0x26d   : > { %v705_v23 = vpop.xlane.xlu1 %704 }
 0x26e   : > { %v2408_v38 = vmax.f32 %v2405_v22, %v705_v23  ;;  %v733_v23 = vsub.f32 %v2336_v54, %v2339_v56 }
 0x270   : > { %1255 = vst.msk [vmem:[#allocation3 + $0x58] sm:$0xff] %vm1034_vm4, %v2408_v38  ;;  %795 = vperm.xlu2 %1865, %v2339_v56   ;;  %835 = vperm.xlu1 %1866, %v2408_v38   ;;  %v741_v54 = vsub.f32 %v2405_v22, %v2408_v38 }
 0x272   : > { %v768_v4 = vmul.f32 1.442695, %v741_v54 }
 0x275   : > { %v707_v45 = vpop.xlane.xlu2 %706 }
 0x276   : > { %v726_v49 = vmax.f32 %v678_v40, %v707_v45 }
 0x278   : > { %v742_v50 = vsub.f32 %v678_v40, %v726_v49  ;;  %1256 = vst.msk [vmem:[#allocation3 + $0x60] sm:$0xff] %vm1034_vm4, %v726_v49  ;;  %840 = vperm.xlu1 %1866, %v726_v49   ;;  %v752_v40 = vmul.f32 1.442695, %v733_v23 }
 0x27a   : > { %v770_v51 = vmul.f32 1.442695, %v742_v50 }
 0x27c   : > { %1872 = vpow2.f32 %v770_v51 }
 0x27d   : > { %v709_v53 = vpop.xlane.xlu1 %708  ;;  %1874 = vpow2.f32 %v748_v6 }
 0x27e   : > { %v2418_v55 = vmax.f32 %v2415_v52, %v709_v53  ;;  %1876 = vpow2.f32 %v754_v44 }
 0x27f   : > { %1878 = vpow2.f32 %v746_v58 }
 0x280   : > { %v743_v59 = vsub.f32 %v2415_v52, %v2418_v55  ;;  %1257 = vst.msk [vmem:[#allocation3 + $0x68] sm:$0xff] %vm1034_vm4, %v2418_v55  ;;  %810 = vperm.xlu1 %1866, %v2367_v3   ;;  %845 = vperm.xlu2 %1865, %v2418_v55   ;;  %1880 = vpow2.f32 %v758_v60  ;;  %v756_v3 = vmul.f32 1.442695, %v735_v1  ;;  %v1101_v52 = vld [vmem:[#allocation5 + $0x8] sm:$0xff] }
 0x281   : > { %1882 = vpow2.f32 %v752_v40 }
 0x282   : > { %v2426_v63 = vpop.eup %1872  ;;  %1884 = vpow2.f32 %v762_v39 }
 0x283   : > { %1178 = vperm.xlu0 %1867, %v2426_v63   ;;  %v2454_v15 = vpop.eup %1874  ;;  %1886 = vpow2.f32 %v756_v3 }
 0x284   : > { %v2468_v61 = vpop.eup %1876  ;;  %1888 = vpow2.f32 %v768_v4 }
 0x285   : > { %v711_v9 = vpop.xlane.xlu2 %710  ;;  %v2477_v41 = vpop.eup %1878 }
 0x286   : > { %v2435_v12 = vmax.f32 %v2429_v2, %v711_v9  ;;  %v2479_v43 = vpop.eup %1880 }
 0x287   : > { %v2487_v10 = vpop.eup %1882 }
 0x288   : > { %v744_v13 = vsub.f32 %v2429_v2, %v2435_v12  ;;  %1258 = vst.msk [vmem:[#allocation3 + $0x70] sm:$0xff] %vm1034_vm4, %v2435_v12  ;;  %850 = vperm.xlu1 %1866, %v2435_v12   ;;  %805 = vperm.xlu2 %1865, %v2360_v0   ;;  %v2491_v49 = vpop.eup %1884  ;;  %v737_v0 = vsub.f32 %v2373_v5, %v2376_v7  ;;  %v938_v12 = vld [vmem:[#allocation4] sm:$0xff] }
 0x28a   : > { %v760_v53 = vmul.f32 1.442695, %v737_v0 }
 0x28d   : > { %v713_v46 = vpop.xlane.xlu1 %712  ;;  %v781_v56 = vpop.permute.xlu2 %780 }
 0x28e   : > { %v2452_v48 = vmax.f32 %v2443_v14, %v713_v46  ;;  %v858_v11 = vsub.f32 %v2269_v24, %v781_v56  ;;  %v2497_v24 = vpop.eup %1886 }
 0x290   : > { %v745_v19 = vsub.f32 %v2443_v14, %v2452_v48  ;;  %1259 = vst.msk [vmem:[#allocation3 + $0x78] sm:$0xff] %vm1034_vm4, %v2452_v48  ;;  %1123 = vperm.xlu1 %1866, %v2454_v15   ;;  %855 = vperm.xlu2 %1865, %v2452_v48   ;;  %v772_v14 = vmul.f32 1.442695, %v743_v59 }
 0x295   : > { %v791_v6 = vpop.permute.xlu2 %790 }
 0x296   : > { %v860_v40 = vsub.f32 %v2275_v26, %v791_v6 }
 0x298   : > { %1138 = vperm.xlu1 %1866, %v2468_v61   ;;  %815 = vperm.xlu2 %1865, %v2376_v7   ;;  %v766_v7 = vmul.f32 1.442695, %v740_v21 }
 0x2a0   : > { %1148 = vperm.xlu1 %1866, %v2479_v43   ;;  %1118 = vperm.xlu2 %1865, %v2477_v41  }
 0x2a5   : > { %v786_v8 = vpop.permute.xlu1 %785 }
 0x2a6   : > { %v859_v45 = vsub.f32 %v2272_v25, %v786_v8  ;;  %v2499_v25 = vpop.eup %1888 }
 0x2a8   : > { %v874_v62 = vpack.c.bf16 %v859_v45, %v858_v11  ;;  %1158 = vperm.xlu1 %1866, %v2491_v49   ;;  %1133 = vperm.xlu2 %1865, %v2487_v10  }
 0x2aa   : > { %v882_v22 = vunpack.c.l.bf16 %v874_v62  ;;  %v883_v38 = vunpack.c.h.bf16 %v874_v62 }
 0x2ac   : > { %v898_v50 = vmul.f32 1.442695, %v882_v22  ;;  %v900_v51 = vmul.f32 1.442695, %v883_v38  ;;  %v821_v16 = vpop.permute.xlu2 %820 }
 0x2ad   : > { %v866_v20 = vsub.f32 %v2293_v32, %v821_v16 }
 0x2ae   : > { %1890 = vpow2.f32 %v898_v50 }
 0x2af   : > { %1892 = vpow2.f32 %v900_v51 }
 0x2b0   : > { %1173 = vperm.xlu1 %1866, %v2499_v25   ;;  %1143 = vperm.xlu2 %1865, %v2497_v24   ;;  %1894 = vpow2.f32 %v760_v53 }
 0x2b1   : > { %1896 = vpow2.f32 %v766_v7 }
 0x2b4   : > { %v1891_v9 = vpop.eup %1890 }
 0x2b5   : > { %v1893_v5 = vpop.eup %1892 }
 0x2b6   : > { %v930_v44 = vpack.c.bf16 %v1893_v5, %v1891_v9  ;;  %v2506_v46 = vpop.eup %1894 }
 0x2b7   : > { %v2509_v58 = vpop.eup %1896 }
 0x2b8   : > { %1059 = vmatmul.bf16.vlgmr.msra.gmra.mxu1 %v930_v44  ;;  %1153 = vperm.xlu2 %1865, %v2506_v46   ;;  %v970_v26 = vunpack.c.l.bf16 %v930_v44 }
 0x2c0   : > { %1168 = vperm.xlu2 %1865, %v2509_v58  }
 0x2c2   : > { %v831_v60 = vpop.permute.xlu2 %830 }
 0x2c3   : > { %v868_v7 = vsub.f32 %v2299_v34, %v831_v60 }
 0x2ca   : > { %v796_v23 = vpop.permute.xlu2 %795 }
 0x2cb   : > { %v861_v39 = vsub.f32 %v2278_v27, %v796_v23 }
 0x2cc   : > { %v826_v17 = vpop.permute.xlu1 %825 }
 0x2cd   : > { %v875_v21 = vpack.c.bf16 %v861_v39, %v860_v40  ;;  %v867_v1 = vsub.f32 %v2296_v33, %v826_v17 }
 0x2cf   : > { %v884_v54 = vunpack.c.l.bf16 %v875_v21  ;;  %v885_v56 = vunpack.c.h.bf16 %v875_v21  ;;  %v878_v3 = vpack.c.bf16 %v867_v1, %v866_v20  ;;  %v971_v20 = vunpack.c.h.bf16 %v930_v44 }
 0x2d1   : > { %v902_v4 = vmul.f32 1.442695, %v884_v54  ;;  %v904_v8 = vmul.f32 1.442695, %v885_v56  ;;  %v890_v11 = vunpack.c.l.bf16 %v878_v3  ;;  %v891_v45 = vunpack.c.h.bf16 %v878_v3 }
 0x2d3   : > { %1898 = vpow2.f32 %v902_v4  ;;  %v914_v62 = vmul.f32 1.442695, %v890_v11  ;;  %v916_v0 = vmul.f32 1.442695, %v891_v45 }
 0x2d4   : > { %1900 = vpow2.f32 %v904_v8  ;;  %v801_v32 = vpop.permute.xlu1 %800 }
 0x2d5   : > { %1902 = vpow2.f32 %v914_v62  ;;  %v862_v16 = vsub.f32 %v2281_v28, %v801_v32 }
 0x2d6   : > { %1904 = vpow2.f32 %v916_v0 }
 0x2d9   : > { %v1899_v27 = vpop.eup %1898 }
 0x2da   : > { %v1901_v22 = vpop.eup %1900  ;;  %v846_v38 = vpop.permute.xlu2 %845  ;;  %986 = vadd.xlane.f32.xlu1 %v970_v26 }
 0x2db   : > { %v1903_v33 = vpop.eup %1902  ;;  %v931_v50 = vpack.c.bf16 %v1901_v22, %v1899_v27  ;;  %v871_v28 = vsub.f32 %v2308_v37, %v846_v38 }
 0x2dc   : > { %v1905_v51 = vpop.eup %1904 }
 0x2dd   : > { %1064 = vmatmul.bf16.gmra.mxu1 %v931_v50  ;;  %v2516_v53 = vpack.c.bf16 %v1905_v51, %v1903_v33  ;;  %v972_v6 = vunpack.c.l.bf16 %v931_v50  ;;  %v973_v44 = vunpack.c.h.bf16 %v931_v50 }
 0x2df   : > { %1079 = vmatmul.bf16.vlgmr.msra.gmra.mxu2 %v2516_v53 }
 0x2e2   : > { %v806_v9 = vpop.permute.xlu2 %805  ;;  %990 = vadd.xlane.f32.xlu1 %v972_v6  ;;  %v836_v5 = vpop.permute.xlu1 %835 }
 0x2e3   : > { %v863_v23 = vsub.f32 %v2284_v29, %v806_v9  ;;  %v869_v40 = vsub.f32 %v2302_v35, %v836_v5 }
 0x2e5   : > { %v876_v39 = vpack.c.bf16 %v863_v23, %v862_v16  ;;  %v879_v17 = vpack.c.bf16 %v869_v40, %v868_v7 }
 0x2e7   : > { %v886_v21 = vunpack.c.l.bf16 %v876_v39  ;;  %v887_v1 = vunpack.c.h.bf16 %v876_v39  ;;  %v892_v54 = vunpack.c.l.bf16 %v879_v17  ;;  %v893_v56 = vunpack.c.h.bf16 %v879_v17 }
 0x2e9   : > { %v906_v3 = vmul.f32 1.442695, %v886_v21  ;;  %v908_v4 = vmul.f32 1.442695, %v887_v1  ;;  %v918_v8 = vmul.f32 1.442695, %v892_v54  ;;  %988 = vadd.xlane.f32.xlu2 %v971_v20 }
 0x2ea   : > { %v920_v11 = vmul.f32 1.442695, %v893_v56  ;;  %v856_v45 = vpop.permute.xlu2 %855  ;;  %v841_v34 = vpop.permute.xlu1 %840 }
 0x2eb   : > { %1906 = vpow2.f32 %v906_v3  ;;  %v870_v29 = vsub.f32 %v2305_v36, %v841_v34 }
 0x2ec   : > { %1908 = vpow2.f32 %v908_v4 }
 0x2ed   : > { %1910 = vpow2.f32 %v918_v8  ;;  %v880_v35 = vpack.c.bf16 %v871_v28, %v870_v29 }
 0x2ee   : > { %1912 = vpow2.f32 %v920_v11 }
 0x2ef   : > { %v894_v62 = vunpack.c.l.bf16 %v880_v35  ;;  %v895_v26 = vunpack.c.h.bf16 %v880_v35 }
 0x2f1   : > { %v1907_v60 = vpop.eup %1906  ;;  %992 = vadd.xlane.f32.xlu2 %v973_v44  ;;  %v922_v36 = vmul.f32 1.442695, %v894_v62  ;;  %v924_v50 = vmul.f32 1.442695, %v895_v26  ;;  %v979_v44 = vunpack.c.h.bf16 %v2516_v53  ;;  %v978_v62 = vunpack.c.l.bf16 %v2516_v53 }
 0x2f2   : > { %v1909_v0 = vpop.eup %1908  ;;  %v816_v27 = vpop.permute.xlu2 %815 }
 0x2f3   : > { %v811_v22 = vpop.permute.xlu1 %810  ;;  %v1911_v32 = vpop.eup %1910  ;;  %v865_v33 = vsub.f32 %v2290_v31, %v816_v27  ;;  %v932_v38 = vpack.c.bf16 %v1909_v0, %v1907_v60  ;;  %1914 = vpow2.f32 %v922_v36  ;;  %v776_v27 = vmul.f32 1.442695, %v745_v19  ;;  %v1100_v19 = vld [vmem:[#allocation5] sm:$0xff] }
 0x2f4   : > { %v864_v37 = vsub.f32 %v2287_v30, %v811_v22  ;;  %v1913_v51 = vpop.eup %1912  ;;  %1916 = vpow2.f32 %v924_v50  ;;  %v873_v30 = vsub.f32 %v2328_v47, %v856_v45 }
 0x2f5   : > { %1069 = vmatmul.bf16.gmra.mxu1 %v932_v38  ;;  %v935_v9 = vpack.c.bf16 %v1913_v51, %v1911_v32  ;;  %v974_v5 = vunpack.c.l.bf16 %v932_v38  ;;  %v975_v23 = vunpack.c.h.bf16 %v932_v38 }
 0x2f6   : > { %v877_v6 = vpack.c.bf16 %v865_v33, %v864_v37 }
 0x2f7   : > { %1084 = vmatmul.bf16.gmra.mxu2 %v935_v9  ;;  %994 = vadd.xlane.f32.xlu1 %v974_v5  ;;  %v981_v0 = vunpack.c.h.bf16 %v935_v9  ;;  %v980_v26 = vunpack.c.l.bf16 %v935_v9  ;;  %v774_v5 = vmul.f32 1.442695, %v744_v13 }
 0x2f8   : > { %v888_v7 = vunpack.c.l.bf16 %v877_v6  ;;  %v889_v16 = vunpack.c.h.bf16 %v877_v6 }
 0x2f9   : > { %996 = vadd.xlane.f32.xlu2 %v975_v23  ;;  %v1915_v21 = vpop.eup %1914 }
 0x2fa   : > { %v910_v40 = vmul.f32 1.442695, %v888_v7  ;;  %v912_v39 = vmul.f32 1.442695, %v889_v16  ;;  %v1917_v56 = vpop.eup %1916  ;;  %v1119_v48 = vpop.permute.xlu2 %1118 }
 0x2fb   : > { %v851_v31 = vpop.permute.xlu1 %850  ;;  %v936_v28 = vpack.c.bf16 %v1917_v56, %v1915_v21  ;;  %v1196_v36 = vmul.f32 %v1119_v48, %v1100_v19  ;;  %v1102_v56 = vld [vmem:[#allocation5 + $0x10] sm:$0xff] }
 0x2fc   : > { %1918 = vpow2.f32 %v910_v40  ;;  %v872_v17 = vsub.f32 %v2316_v42, %v851_v31  ;;  %v954_v31 = vmul.f32 %v2477_v41, %v938_v12  ;;  %v1110_v12 = vld [vmem:[#allocation5 + $0x50] sm:$0xff] }
 0x2fd   : > { %1920 = vpow2.f32 %v912_v39  ;;  %v983_v32 = vunpack.c.h.bf16 %v936_v28  ;;  %v982_v33 = vunpack.c.l.bf16 %v936_v28 }
 0x2fe   : > { %v881_v20 = vpack.c.bf16 %v873_v30, %v872_v17 }
 0x300   : > { %v896_v1 = vunpack.c.l.bf16 %v881_v20  ;;  %v897_v54 = vunpack.c.h.bf16 %v881_v20  ;;  %v940_v20 = vld [vmem:[#allocation4 + $0x10] sm:$0xff] }
 0x302   : > { %v1919_v3 = vpop.eup %1918  ;;  %v926_v4 = vmul.f32 1.442695, %v896_v1  ;;  %v928_v8 = vmul.f32 1.442695, %v897_v54  ;;  %v1134_v50 = vpop.permute.xlu2 %1133  ;;  %v956_v1 = vmul.f32 %v2344_v57, %v940_v20  ;;  %v941_v57 = vld [vmem:[#allocation4 + $0x18] sm:$0xff] }
 0x303   : > { %v1921_v11 = vpop.eup %1920  ;;  %v1124_v22 = vpop.permute.xlu1 %1123 }
 0x304   : > { %1922 = vpow2.f32 %v926_v4  ;;  %v933_v34 = vpack.c.bf16 %v1921_v11, %v1919_v3  ;;  %v1197_v59 = vmul.f32 %v1124_v22, %v1101_v52  ;;  %v1129_v3 = vpop.permute.xlu0 %1128 }
 0x305   : > { %1924 = vpow2.f32 %v928_v8  ;;  %v939_v8 = vld [vmem:[#allocation4 + $0x8] sm:$0xff]  ;;  %v1198_v11 = vmul.f32 %v1129_v3, %v1102_v56 }
 0x306   : > { %1074 = vmatmul.bf16.gmra.mxu1 %v933_v34  ;;  %v977_v29 = vunpack.c.h.bf16 %v933_v34  ;;  %v976_v47 = vunpack.c.l.bf16 %v933_v34  ;;  %1926 = vpow2.f32 %v776_v27  ;;  %v955_v41 = vmul.f32 %v2454_v15, %v939_v8 }
 0x307   : > { %1089 = vmatmul.bf16.gmra.mxu2 %v936_v28  ;;  %1928 = vpow2.f32 %v772_v14  ;;  %v957_v27 = vmul.f32 %v2487_v10, %v941_v57  ;;  %v943_v14 = vld [vmem:[#allocation4 + $0x28] sm:$0xff] }
 0x308   : > { %1000 = vadd.xlane.f32.xlu2 %v977_v29  ;;  %998 = vadd.xlane.f32.xlu1 %v976_v47  ;;  %1930 = vpow2.f32 %v774_v5  ;;  %v959_v10 = vmul.f32 %v2497_v24, %v943_v14 }
 0x30a   : > { %v1923_v42 = vpop.eup %1922  ;;  %v2553_v39 = vpop.permute.xlu2 %1143 }
 0x30b   : > { %v1925_v45 = vpop.eup %1924  ;;  %v2537_v38 = vpop.permute.xlu1 %1138 }
 0x30c   : > { %v937_v35 = vpack.c.bf16 %v1925_v45, %v1923_v42  ;;  %v2534_v37 = vpop.eup %1926  ;;  %v1103_v42 = vld [vmem:[#allocation5 + $0x18] sm:$0xff]  ;;  %v1108_v45 = vld [vmem:[#allocation5 + $0x40] sm:$0xff] }
 0x30d   : > { %v2544_v9 = vpop.eup %1928 }
 0x30e   : > { %v985_v60 = vunpack.c.h.bf16 %v937_v35  ;;  %v984_v53 = vunpack.c.l.bf16 %v937_v35  ;;  %v2551_v40 = vpop.eup %1930 }
 0x310   : > { %1004 = vadd.xlane.f32.xlu2 %v979_v44  ;;  %1016 = vadd.xlane.f32.xlu0 %v985_v60 }
 0x311   : > { %1002 = vadd.xlane.f32.xlu1 %v978_v62 }
 0x312   : > { %v2559_v13 = vpop.permute.xlu2 %1153 }
 0x313   : > { %v2542_v51 = vpop.permute.xlu1 %1148 }
 0x317   : > { %1094 = vmatmul.bf16.gmra.mxu2 %v937_v35  ;;  %v1199_v35 = vmul.f32 %v1134_v50, %v1103_v42 }
 0x318   : > { %1008 = vadd.xlane.f32.xlu2 %v981_v0 }
 0x319   : > { %1006 = vadd.xlane.f32.xlu1 %v980_v26 }
 0x31a   : > { %v1169_v21 = vpop.permute.xlu2 %1168 }
 0x31b   : > { %v1159_v55 = vpop.permute.xlu1 %1158  ;;  %v1206_v20 = vmul.f32 %v1169_v21, %v1110_v12  ;;  %v953_v21 = vld [vmem:[#allocation4 + $0x78] sm:$0xff]  ;;  %v952_v12 = vld [vmem:[#allocation4 + $0x70] sm:$0xff] }
 0x31c   : > { %v1204_v44 = vmul.f32 %v1159_v55, %v1108_v45  ;;  %v1104_v55 = vld [vmem:[#allocation5 + $0x20] sm:$0xff] }
 0x320   : > { %1012 = vadd.xlane.f32.xlu2 %v983_v32  ;;  %v1109_v32 = vld [vmem:[#allocation5 + $0x48] sm:$0xff] }
 0x321   : > { %1010 = vadd.xlane.f32.xlu1 %v982_v33  ;;  %v1164_v33 = vpop.permute.xlu0 %1163 }
 0x322   : > { %v1205_v48 = vmul.f32 %v1164_v33, %v1109_v32  ;;  %v1112_v32 = vld [vmem:[#allocation5 + $0x60] sm:$0xff] }
 0x323   : > { %v2557_v2 = vpop.permute.xlu1 %1173 }
 0x324   : > { %1193 = vperm.xlu0 %1867, %v2534_v37  }
 0x329   : > { %1014 = vadd.xlane.f32.xlu1 %v984_v53  ;;  %v942_v53 = vld [vmem:[#allocation4 + $0x20] sm:$0xff]  ;;  %v1179_v24 = vpop.permute.xlu0 %1178 }
 0x32a   : > { %v958_v19 = vmul.f32 %v2468_v61, %v942_v53  ;;  %v1105_v61 = vld [vmem:[#allocation5 + $0x28] sm:$0xff]  ;;  %v1208_v33 = vmul.f32 %v1179_v24, %v1112_v32 }
 0x335   : > { %v1060_v6 = vpop.f32.mrf.mxu1 }
 0x336   : > { %v1212_v7 = vadd.f32 %v1196_v36, %v1060_v6 }
 0x338   : > { %1183 = vperm.xlu2 %1865, %v2544_v9   ;;  %1228 = vst.msk [vmem:[#allocation5] sm:$0xff] %vm588_vm3, %v1212_v7 }
 0x33d   : > { %v1062_v16 = vpop.f32.mrf.mxu1 }
 0x33e   : > { %v1213_v23 = vadd.f32 %v1197_v59, %v1062_v16  ;;  %v1200_v59 = vmul.f32 %v2537_v38, %v1104_v55 }
 0x340   : > { %1229 = vst.msk [vmem:[#allocation5 + $0x8] sm:$0xff] %vm588_vm3, %v1213_v23 }
 0x342   : > { %1188 = vperm.xlu1 %1866, %v2551_v40  }
 0x34d   : > { %v987_v30 = vpop.xlane.xlu1 %986 }
 0x34e   : > { %v1018_v17 = vadd.f32 %v987_v30, %v954_v31  ;;  %v945_v31 = vld [vmem:[#allocation4 + $0x38] sm:$0xff]  ;;  %v944_v30 = vld [vmem:[#allocation4 + $0x30] sm:$0xff] }
 0x34f   : > { %v961_v56 = vmul.f32 %v2506_v46, %v945_v31  ;;  %v960_v3 = vmul.f32 %v2479_v43, %v944_v30  ;;  %v946_v46 = vld [vmem:[#allocation4 + $0x40] sm:$0xff]  ;;  %v1113_v31 = vld [vmem:[#allocation5 + $0x68] sm:$0xff] }
 0x350   : > { %1035 = vst.msk [vmem:[#allocation4] sm:$0xff] %vm1034_vm4, %v1018_v17  ;;  %v1201_v17 = vmul.f32 %v2553_v39, %v1105_v61  ;;  %v947_v39 = vld [vmem:[#allocation4 + $0x48] sm:$0xff] }
 0x351   : > { %v963_v57 = vmul.f32 %v2394_v18, %v947_v39  ;;  %v949_v18 = vld [vmem:[#allocation4 + $0x58] sm:$0xff] }
 0x355   : > { %v991_v54 = vpop.xlane.xlu1 %990 }
 0x356   : > { %v1020_v4 = vadd.f32 %v991_v54, %v956_v1 }
 0x358   : > { %1037 = vst.msk [vmem:[#allocation4 + $0x10] sm:$0xff] %vm1034_vm4, %v1020_v4 }
 0x35a   : > { %v1065_v34 = vpop.f32.mrf.mxu1 }
 0x35b   : > { %v1214_v28 = vadd.f32 %v1198_v11, %v1065_v34 }
 0x35c   : > { %v989_v29 = vpop.xlane.xlu2 %988 }
 0x35d   : > { %1230 = vst.msk [vmem:[#allocation5 + $0x10] sm:$0xff] %vm588_vm3, %v1214_v28  ;;  %v1019_v47 = vadd.f32 %v989_v29, %v955_v41  ;;  %v1106_v41 = vld [vmem:[#allocation5 + $0x30] sm:$0xff]  ;;  %v1111_v29 = vld [vmem:[#allocation5 + $0x58] sm:$0xff] }
 0x35e   : > { %v1202_v43 = vmul.f32 %v2542_v51, %v1106_v41 }
 0x35f   : > { %1036 = vst.msk [vmem:[#allocation4 + $0x8] sm:$0xff] %vm1034_vm4, %v1019_v47  ;;  %v1207_v47 = vmul.f32 %v2557_v2, %v1111_v29  ;;  %v1107_v2 = vld [vmem:[#allocation5 + $0x38] sm:$0xff] }
 0x360   : > { %v1203_v53 = vmul.f32 %v2559_v13, %v1107_v2  ;;  %v951_v13 = vld [vmem:[#allocation4 + $0x68] sm:$0xff] }
 0x362   : > { %v1067_v60 = vpop.f32.mrf.mxu1  ;;  %v1080_v62 = vpop.f32.mrf.mxu2 }
 0x363   : > { %v1215_v0 = vadd.f32 %v1199_v35, %v1067_v60  ;;  %v1220_v26 = vadd.f32 %v1204_v44, %v1080_v62  ;;  %v969_v35 = vmul.f32 %v2534_v37, %v953_v21  ;;  %v948_v37 = vld [vmem:[#allocation4 + $0x50] sm:$0xff] }
 0x364   : > { %v993_v22 = vpop.xlane.xlu2 %992 }
 0x365   : > { %1231 = vst.msk [vmem:[#allocation5 + $0x18] sm:$0xff] %vm588_vm3, %v1215_v0  ;;  %v1021_v15 = vadd.f32 %v993_v22, %v957_v27 }
 0x366   : > { %1236 = vst.msk [vmem:[#allocation5 + $0x40] sm:$0xff] %vm588_vm3, %v1220_v26  ;;  %v962_v26 = vmul.f32 %v2491_v49, %v946_v46 }
 0x367   : > { %1038 = vst.msk [vmem:[#allocation4 + $0x18] sm:$0xff] %vm1034_vm4, %v1021_v15 }
 0x36a   : > { %v1082_v36 = vpop.f32.mrf.mxu2  ;;  %v995_v6 = vpop.xlane.xlu1 %994 }
 0x36b   : > { %v1221_v5 = vadd.f32 %v1205_v48, %v1082_v36  ;;  %v1022_v50 = vadd.f32 %v995_v6, %v958_v19  ;;  %v965_v48 = vmul.f32 %v2499_v25, %v949_v18  ;;  %v967_v25 = vmul.f32 %v2544_v9, %v951_v13  ;;  %v1115_v9 = vld [vmem:[#allocation5 + $0x78] sm:$0xff] }
 0x36c   : > { %v997_v7 = vpop.xlane.xlu2 %996 }
 0x36d   : > { %1237 = vst.msk [vmem:[#allocation5 + $0x48] sm:$0xff] %vm588_vm3, %v1221_v5  ;;  %v1023_v52 = vadd.f32 %v997_v7, %v959_v10  ;;  %v964_v5 = vmul.f32 %v2509_v58, %v948_v37 }
 0x36e   : > { %1039 = vst.msk [vmem:[#allocation4 + $0x20] sm:$0xff] %vm1034_vm4, %v1022_v50 }
 0x36f   : > { %1040 = vst.msk [vmem:[#allocation4 + $0x28] sm:$0xff] %vm1034_vm4, %v1023_v52  ;;  %v950_v52 = vld [vmem:[#allocation4 + $0x60] sm:$0xff] }
 0x372   : > { %v1070_v16 = vpop.f32.mrf.mxu1 }
 0x373   : > { %v1216_v23 = vadd.f32 %v1200_v59, %v1070_v16  ;;  %v966_v16 = vmul.f32 %v2426_v63, %v950_v52 }
 0x375   : > { %1232 = vst.msk [vmem:[#allocation5 + $0x20] sm:$0xff] %vm588_vm3, %v1216_v23 }
 0x37a   : > { %v1085_v1 = vpop.f32.mrf.mxu2  ;;  %v1072_v54 = vpop.f32.mrf.mxu1 }
 0x37b   : > { %v1222_v4 = vadd.f32 %v1206_v20, %v1085_v1  ;;  %v1217_v38 = vadd.f32 %v1201_v17, %v1072_v54  ;;  %v1001_v8 = vpop.xlane.xlu2 %1000  ;;  %v999_v11 = vpop.xlane.xlu1 %998  ;;  %v968_v17 = vmul.f32 %v2551_v40, %v952_v12 }
 0x37c   : > { %v1025_v34 = vadd.f32 %v1001_v8, %v961_v56  ;;  %v1024_v28 = vadd.f32 %v999_v11, %v960_v3  ;;  %v1114_v8 = vld [vmem:[#allocation5 + $0x70] sm:$0xff] }
 0x37d   : > { %1238 = vst.msk [vmem:[#allocation5 + $0x50] sm:$0xff] %vm588_vm3, %v1222_v4 }
 0x37e   : > { %1233 = vst.msk [vmem:[#allocation5 + $0x28] sm:$0xff] %vm588_vm3, %v1217_v38 }
 0x37f   : > { %1042 = vst.msk [vmem:[#allocation4 + $0x38] sm:$0xff] %vm1034_vm4, %v1025_v34 }
 0x380   : > { %1041 = vst.msk [vmem:[#allocation4 + $0x30] sm:$0xff] %vm1034_vm4, %v1024_v28 }
 0x382   : > { %v1087_v42 = vpop.f32.mrf.mxu2 }
 0x383   : > { %v1075_v45 = vpop.f32.mrf.mxu1  ;;  %v1223_v44 = vadd.f32 %v1207_v47, %v1087_v42  ;;  %v1005_v62 = vpop.xlane.xlu2 %1004 }
 0x384   : > { %v1218_v60 = vadd.f32 %v1202_v43, %v1075_v45  ;;  %v1017_v0 = vpop.xlane.xlu0 %1016  ;;  %v1027_v27 = vadd.f32 %v1005_v62, %v963_v57  ;;  %v1003_v15 = vpop.xlane.xlu1 %1002 }
 0x385   : > { %v1033_v22 = vadd.f32 %v1017_v0, %v969_v35  ;;  %1239 = vst.msk [vmem:[#allocation5 + $0x58] sm:$0xff] %vm588_vm3, %v1223_v44  ;;  %v1026_v51 = vadd.f32 %v1003_v15, %v962_v26 }
 0x386   : > { %1234 = vst.msk [vmem:[#allocation5 + $0x30] sm:$0xff] %vm588_vm3, %v1218_v60 }
 0x387   : > { %1044 = vst.msk [vmem:[#allocation4 + $0x48] sm:$0xff] %vm1034_vm4, %v1027_v27 }
 0x388   : > { %1050 = vst.msk [vmem:[#allocation4 + $0x78] sm:$0xff] %vm1034_vm4, %v1033_v22 }
 0x389   : > { %1043 = vst.msk [vmem:[#allocation4 + $0x40] sm:$0xff] %vm1034_vm4, %v1026_v51 }
 0x38a   : > { %v1090_v49 = vpop.f32.mrf.mxu2 }
 0x38b   : > { %v1077_v14 = vpop.f32.mrf.mxu1  ;;  %v1224_v19 = vadd.f32 %v1208_v33, %v1090_v49  ;;  %v1009_v6 = vpop.xlane.xlu2 %1008 }
 0x38c   : > { %v1219_v36 = vadd.f32 %v1203_v53, %v1077_v14  ;;  %v1029_v50 = vadd.f32 %v1009_v6, %v965_v48  ;;  %v1007_v10 = vpop.xlane.xlu1 %1006 }
 0x38d   : > { %1240 = vst.msk [vmem:[#allocation5 + $0x60] sm:$0xff] %vm588_vm3, %v1224_v19  ;;  %v1028_v7 = vadd.f32 %v1007_v10, %v964_v5 }
 0x38e   : > { %1235 = vst.msk [vmem:[#allocation5 + $0x38] sm:$0xff] %vm588_vm3, %v1219_v36 }
 0x38f   : > { %1046 = vst.msk [vmem:[#allocation4 + $0x58] sm:$0xff] %vm1034_vm4, %v1029_v50 }
 0x390   : > { %1045 = vst.msk [vmem:[#allocation4 + $0x50] sm:$0xff] %vm1034_vm4, %v1028_v7 }
 0x392   : > { %v1092_v55 = vpop.f32.mrf.mxu2 }
 0x393   : > { %v1013_v59 = vpop.xlane.xlu2 %1012 }
 0x394   : > { %v1031_v58 = vadd.f32 %v1013_v59, %v967_v25  ;;  %v1011_v23 = vpop.xlane.xlu1 %1010 }
 0x395   : > { %v1030_v61 = vadd.f32 %v1011_v23, %v966_v16 }
 0x396   : > { %1048 = vst.msk [vmem:[#allocation4 + $0x68] sm:$0xff] %vm1034_vm4, %v1031_v58  ;;  %v1194_v56 = vpop.permute.xlu0 %1193 }
 0x397   : > { %1047 = vst.msk [vmem:[#allocation4 + $0x60] sm:$0xff] %vm1034_vm4, %v1030_v61  ;;  %v1211_v63 = vmul.f32 %v1194_v56, %v1115_v9 }
 0x39a   : > { %v1095_v30 = vpop.f32.mrf.mxu2 }
 0x39b   : > { %v1184_v24 = vpop.permute.xlu2 %1183 }
 0x39c   : > { %v1209_v20 = vmul.f32 %v1184_v24, %v1113_v31  ;;  %v1015_v1 = vpop.xlane.xlu1 %1014 }
 0x39d   : > { %v1032_v54 = vadd.f32 %v1015_v1, %v968_v17 }
 0x39e   : > { %v1225_v3 = vadd.f32 %v1209_v20, %v1092_v55 }
 0x39f   : > { %1049 = vst.msk [vmem:[#allocation4 + $0x70] sm:$0xff] %vm1034_vm4, %v1032_v54 }
 0x3a0   : > { %1241 = vst.msk [vmem:[#allocation5 + $0x68] sm:$0xff] %vm588_vm3, %v1225_v3 }
 0x3a2   : > { %v1097_v4 = vpop.f32.mrf.mxu2 }
 0x3a3   : > { %v1227_v38 = vadd.f32 %v1211_v63, %v1097_v4 }
 0x3a5   : > { %1243 = vst.msk [vmem:[#allocation5 + $0x78] sm:$0xff] %vm588_vm3, %v1227_v38 }
 0x3b4   : > { %v1189_v11 = vpop.permute.xlu1 %1188 }
 0x3b5   : > { %v1210_v34 = vmul.f32 %v1189_v11, %v1114_v8  ;;  %1263 = sbr.rel (%p1745_p2) target bundleno = 1278 (0x4fe), region = 98 }
 0x3b7   : > { %v1226_v28 = vadd.f32 %v1210_v34, %v1095_v30 }
 0x3b9   : > { %1242 = vst.msk [vmem:[#allocation5 + $0x70] sm:$0xff] %vm588_vm3, %v1226_v28 }
 0x3ba   : > { %v1295_v40 = vld [vmem:[#allocation4 + $0x78] sm:$0xff]  ;;  %v1293_v41 = vld [vmem:[#allocation4 + $0x68] sm:$0xff]  ;;  %v2042_v39 = vmov 0   ;;  %v1294_v21 = vld [vmem:[#allocation4 + $0x70] sm:$0xff] }
 0x3bb   : > { %v1291_v29 = vld [vmem:[#allocation4 + $0x58] sm:$0xff]  ;;  %1934 = vset.pattern.permute.xlu2 %v2042_v39  ;;  %1933 = vset.pattern.permute.xlu1 %v2042_v39  ;;  %1935 = vrcp.f32 %v1295_v40  ;;  %v1292_v46 = vld [vmem:[#allocation4 + $0x60] sm:$0xff]  ;;  %v1290_v43 = vld [vmem:[#allocation4 + $0x50] sm:$0xff] }
 0x3bc   : > { %1932 = vset.pattern.permute.xlu0 %v2042_v39  ;;  %1937 = vrcp.f32 %v1293_v41  ;;  %v1289_v57 = vld [vmem:[#allocation4 + $0x48] sm:$0xff]  ;;  %v1288_v44 = vld [vmem:[#allocation4 + $0x40] sm:$0xff]  ;;  %v1287_v62 = vld [vmem:[#allocation4 + $0x38] sm:$0xff] }
 0x3bd   : > { %1939 = vrcp.f32 %v1291_v29  ;;  %v1286_v26 = vld [vmem:[#allocation4 + $0x30] sm:$0xff]  ;;  %v1285_v22 = vld [vmem:[#allocation4 + $0x28] sm:$0xff]  ;;  %v1284_v51 = vld [vmem:[#allocation4 + $0x20] sm:$0xff] }
 0x3be   : > { %1941 = vrcp.f32 %v1294_v21  ;;  %v1283_v2 = vld [vmem:[#allocation4 + $0x18] sm:$0xff]  ;;  %v1282_v37 = vld [vmem:[#allocation4 + $0x10] sm:$0xff]  ;;  %v1281_v53 = vld [vmem:[#allocation4 + $0x8] sm:$0xff] }
 0x3bf   : > { %1943 = vrcp.f32 %v1292_v46  ;;  %v1280_v14 = vld [vmem:[#allocation4] sm:$0xff]  ;;  %v1279_v10 = vld [vmem:[#allocation5 + $0x78] sm:$0xff]  ;;  %v1277_v16 = vld [vmem:[#allocation5 + $0x68] sm:$0xff] }
 0x3c0   : > { %1945 = vrcp.f32 %v1290_v43  ;;  %v1410_v5 = vld [vmem:[%s2707_s6] sm:$0xff]  ;;  %v1411_v50 = vld [vmem:[%s2707_s6 + $0x8] sm:$0xff]  ;;  %v1278_v55 = vld [vmem:[#allocation5 + $0x70] sm:$0xff] }
 0x3c1   : > { %v1936_v47 = vpop.eup %1935  ;;  %1947 = vrcp.f32 %v1289_v57  ;;  %v1276_v12 = vld [vmem:[#allocation5 + $0x60] sm:$0xff]  ;;  %v1275_v30 = vld [vmem:[#allocation5 + $0x58] sm:$0xff]  ;;  %v1274_v17 = vld [vmem:[#allocation5 + $0x50] sm:$0xff] }
 0x3c2   : > { %v1938_v42 = vpop.eup %1937  ;;  %1389 = vperm.xlu0 %1932, %v1936_v47   ;;  %1949 = vrcp.f32 %v1288_v44  ;;  %v1273_v9 = vld [vmem:[#allocation5 + $0x48] sm:$0xff]  ;;  %v1272_v63 = vld [vmem:[#allocation5 + $0x40] sm:$0xff]  ;;  %v1271_v38 = vld [vmem:[#allocation5 + $0x38] sm:$0xff] }
 0x3c3   : > { %v1940_v45 = vpop.eup %1939  ;;  %1379 = vperm.xlu1 %1933, %v1938_v42   ;;  %1951 = vrcp.f32 %v1287_v62  ;;  %v1270_v28 = vld [vmem:[#allocation5 + $0x30] sm:$0xff]  ;;  %v1269_v29 = vld [vmem:[#allocation5 + $0x28] sm:$0xff]  ;;  %v1268_v21 = vld [vmem:[#allocation5 + $0x20] sm:$0xff] }
 0x3c4   : > { %1369 = vperm.xlu2 %1934, %v1940_v45   ;;  %v1942_v35 = vpop.eup %1941  ;;  %1953 = vrcp.f32 %v1286_v26  ;;  %v1267_v42 = vld [vmem:[#allocation5 + $0x18] sm:$0xff] }
 0x3c5   : > { %v1944_v60 = vpop.eup %1943  ;;  %1955 = vrcp.f32 %v1285_v22 }
 0x3c6   : > { %v1946_v0 = vpop.eup %1945  ;;  %1957 = vrcp.f32 %v1284_v51  ;;  %v1409_v51 = vld [vmem:[%s2706_s5 + $0x8] sm:$0xff] }
 0x3c7   : > { %v1948_v27 = vpop.eup %1947  ;;  %1959 = vrcp.f32 %v1283_v2 }
 0x3c8   : > { %v1950_v15 = vpop.eup %1949  ;;  %1961 = vrcp.f32 %v1282_v37  ;;  %v1499_v37 = vld [vmem:[%s399_s20] sm:$0xff] }
 0x3c9   : > { %v1952_v32 = vpop.eup %1951  ;;  %1963 = vrcp.f32 %v1281_v53  ;;  %v1500_v53 = vld [vmem:[%s399_s20 + $0x8] sm:$0xff] }
 0x3ca   : > { %1384 = vperm.xlu0 %1932, %v1942_v35   ;;  %v1954_v18 = vpop.eup %1953  ;;  %1965 = vrcp.f32 %v1280_v14  ;;  %v1266_v35 = vld [vmem:[#allocation5 + $0x10] sm:$0xff] }
 0x3cb   : > { %1374 = vperm.xlu1 %1933, %v1944_v60   ;;  %v1956_v33 = vpop.eup %1955  ;;  %v1265_v60 = vld [vmem:[#allocation5 + $0x8] sm:$0xff] }
 0x3cc   : > { %1364 = vperm.xlu2 %1934, %v1946_v0   ;;  %v1958_v49 = vpop.eup %1957 }
 0x3cd   : > { %v1960_v48 = vpop.eup %1959 }
 0x3ce   : > { %v1962_v19 = vpop.eup %1961 }
 0x3cf   : > { %v1964_v36 = vpop.eup %1963 }
 0x3d0   : > { %v1966_v6 = vpop.eup %1965 }
 0x3d2   : > { %1359 = vperm.xlu0 %1932, %v1948_v27   ;;  %v1264_v27 = vld [vmem:[#allocation5] sm:$0xff] }
 0x3d3   : > { %1354 = vperm.xlu1 %1933, %v1950_v15   ;;  %v1408_v15 = vld [vmem:[%s2706_s5] sm:$0xff] }
 0x3d4   : > { %1349 = vperm.xlu2 %1934, %v1952_v32  }
 0x3da   : > { %1344 = vperm.xlu0 %1932, %v1954_v18  }
 0x3db   : > { %1339 = vperm.xlu1 %1933, %v1956_v33  }
 0x3dc   : > { %1334 = vperm.xlu2 %1934, %v1958_v49  }
 0x3e2   : > { %1329 = vperm.xlu0 %1932, %v1960_v48  }
 0x3e3   : > { %1324 = vperm.xlu1 %1933, %v1962_v19  }
 0x3e4   : > { %1319 = vperm.xlu2 %1934, %v1964_v36  }
 0x3ea   : > { %1314 = vperm.xlu0 %1932, %v1966_v6  }
 0x3eb   : > { %1414 = vperm.xlu1 %1933, %v1410_v5  }
 0x3ec   : > { %1419 = vperm.xlu2 %1934, %v1411_v50  }
 0x41e   : > { %v1370_v23 = vpop.permute.xlu2 %1369 }
 0x41f   : > { %v1403_v24 = vmul.f32 %v1370_v23, %v1275_v30 }
 0x426   : > { %v1365_v20 = vpop.permute.xlu2 %1364 }
 0x427   : > { %v1402_v1 = vmul.f32 %v1365_v20, %v1274_v17 }
 0x42e   : > { %v1350_v8 = vpop.permute.xlu2 %1349 }
 0x42f   : > { %v1399_v11 = vmul.f32 %v1350_v8, %v1271_v38 }
 0x434   : > { %v1390_v7 = vpop.permute.xlu0 %1389 }
 0x435   : > { %v1407_v13 = vmul.f32 %v1390_v7, %v1279_v10  ;;  %v1380_v52 = vpop.permute.xlu1 %1379 }
 0x436   : > { %v1405_v58 = vmul.f32 %v1380_v52, %v1277_v16  ;;  %v1335_v46 = vpop.permute.xlu2 %1334 }
 0x437   : > { %1746 = vmatpush.xpose.msk.msra.mxu0 %vm588_vm3, %v1407_v13  ;;  %1773 = vmatpush.xpose.msk.msra.mxu1 %vm588_vm3, %v1407_v13  ;;  %v1396_v43 = vmul.f32 %v1335_v46, %v1268_v21 }
 0x43c   : > { %v1385_v25 = vpop.permute.xlu0 %1384 }
 0x43d   : > { %v1406_v59 = vmul.f32 %v1385_v25, %v1278_v55  ;;  %v1375_v61 = vpop.permute.xlu1 %1374 }
 0x43e   : > { %v1404_v31 = vmul.f32 %v1375_v61, %v1276_v12  ;;  %v1320_v62 = vpop.permute.xlu2 %1319 }
 0x43f   : > { %1747 = vmatpush.xpose.msk.msra.mxu0 %vm588_vm3, %v1406_v59  ;;  %1774 = vmatpush.xpose.msk.msra.mxu1 %vm588_vm3, %v1406_v59  ;;  %v1393_v0 = vmul.f32 %v1320_v62, %v1265_v60 }
 0x443   : > { %1748 = vmatpush.xpose.msk.msra.mxu0 %vm588_vm3, %v1405_v58  ;;  %1775 = vmatpush.xpose.msk.msra.mxu1 %vm588_vm3, %v1405_v58 }
 0x444   : > { %v1360_v54 = vpop.permute.xlu0 %1359 }
 0x445   : > { %v1401_v56 = vmul.f32 %v1360_v54, %v1273_v9  ;;  %v1355_v3 = vpop.permute.xlu1 %1354 }
 0x446   : > { %v1400_v4 = vmul.f32 %v1355_v3, %v1272_v63  ;;  %v1420_v32 = vpop.permute.xlu2 %1419 }
 0x447   : > { %1749 = vmatpush.xpose.msk.msra.mxu0 %vm588_vm3, %v1404_v31  ;;  %1776 = vmatpush.xpose.msk.msra.mxu1 %vm588_vm3, %v1404_v31 }
 0x44b   : > { %1750 = vmatpush.xpose.msk.msra.mxu0 %vm588_vm3, %v1403_v24  ;;  %1777 = vmatpush.xpose.msk.msra.mxu1 %vm588_vm3, %v1403_v24 }
 0x44c   : > { %v1345_v34 = vpop.permute.xlu0 %1344 }
 0x44d   : > { %v1398_v40 = vmul.f32 %v1345_v34, %v1270_v28  ;;  %v1340_v41 = vpop.permute.xlu1 %1339 }
 0x44e   : > { %v1397_v39 = vmul.f32 %v1340_v41, %v1269_v29 }
 0x44f   : > { %1751 = vmatpush.xpose.msk.msra.mxu0 %vm588_vm3, %v1402_v1  ;;  %1778 = vmatpush.xpose.msk.msra.mxu1 %vm588_vm3, %v1402_v1 }
 0x453   : > { %1752 = vmatpush.xpose.msk.msra.mxu0 %vm588_vm3, %v1401_v56  ;;  %1779 = vmatpush.xpose.msk.msra.mxu1 %vm588_vm3, %v1401_v56 }
 0x454   : > { %v1330_v47 = vpop.permute.xlu0 %1329 }
 0x455   : > { %v1395_v45 = vmul.f32 %v1330_v47, %v1267_v42  ;;  %v1325_v57 = vpop.permute.xlu1 %1324 }
 0x456   : > { %v1394_v44 = vmul.f32 %v1325_v57, %v1266_v35 }
 0x457   : > { %1753 = vmatpush.xpose.msk.msra.mxu0 %vm588_vm3, %v1400_v4  ;;  %1780 = vmatpush.xpose.msk.msra.mxu1 %vm588_vm3, %v1400_v4 }
 0x45b   : > { %1754 = vmatpush.xpose.msk.msra.mxu0 %vm588_vm3, %v1399_v11  ;;  %1781 = vmatpush.xpose.msk.msra.mxu1 %vm588_vm3, %v1399_v11 }
 0x45c   : > { %v1315_v26 = vpop.permute.xlu0 %1314 }
 0x45d   : > { %v1392_v22 = vmul.f32 %v1315_v26, %v1264_v27  ;;  %v1415_v2 = vpop.permute.xlu1 %1414 }
 0x45f   : > { %1755 = vmatpush.xpose.msk.msra.mxu0 %vm588_vm3, %v1398_v40  ;;  %1782 = vmatpush.xpose.msk.msra.mxu1 %vm588_vm3, %v1398_v40 }
 0x463   : > { %1756 = vmatpush.xpose.msk.msra.mxu0 %vm588_vm3, %v1397_v39  ;;  %1783 = vmatpush.xpose.msk.msra.mxu1 %vm588_vm3, %v1397_v39 }
 0x467   : > { %1757 = vmatpush.xpose.msk.msra.mxu0 %vm588_vm3, %v1396_v43  ;;  %1784 = vmatpush.xpose.msk.msra.mxu1 %vm588_vm3, %v1396_v43 }
 0x46b   : > { %1758 = vmatpush.xpose.msk.msra.mxu0 %vm588_vm3, %v1395_v45  ;;  %1785 = vmatpush.xpose.msk.msra.mxu1 %vm588_vm3, %v1395_v45 }
 0x46f   : > { %1759 = vmatpush.xpose.msk.msra.mxu0 %vm588_vm3, %v1394_v44  ;;  %1786 = vmatpush.xpose.msk.msra.mxu1 %vm588_vm3, %v1394_v44 }
 0x473   : > { %1760 = vmatpush.xpose.msk.msra.mxu0 %vm588_vm3, %v1393_v0  ;;  %1787 = vmatpush.xpose.msk.msra.mxu1 %vm588_vm3, %v1393_v0 }
 0x477   : > { %1761 = vmatpush.xpose.msk.msra.mxu0 %vm588_vm3, %v1392_v22  ;;  %1788 = vmatpush.xpose.msk.msra.mxu1 %vm588_vm3, %v1392_v22 }
 0x47a   : > { %1762 = vmatmul.msk.f32.vlgmr.msra.gmra.mxu0 %vm588_vm3, %v1408_v15  ;;  %1763 = vmatmul.msk.f32.vlgmr.msra.gmra.mxu1 %vm588_vm3, %v1409_v51 }
 0x4f7   : > { %v1493_v18 = vpop.f32.mrf.mxu0  ;;  %v1496_v33 = vpop.f32.mrf.mxu1 }
 0x4f8   : > { %v1494_v49 = vadd.f32 %v1493_v18, %v1415_v2  ;;  %v1497_v14 = vadd.f32 %v1496_v33, %v1420_v32 }
 0x4fa   : > { %v1501_v48 = vadd.f32 %v1499_v37, %v1494_v49  ;;  %v1502_v19 = vadd.f32 %v1500_v53, %v1497_v14 }
 0x4fc   : > { %1503 = vst [vmem:[%s2203_s3] sm:$0xff] %v1501_v48 }
 0x4fd   : > { %1504 = vst [vmem:[%s2203_s3 + $0x8] sm:$0xff] %v1502_v19 }
 0x4fe PF: > { %1511 = sbr.rel (!%p2150_p6) target bundleno = 1286 (0x506), region = 102  ;;  %s1765_s17 = sshll.u32 (%p2150_p6), %s2021_s9, 2 }
 0x4ff   : > { %s1513_s18 = sadd.s32 (%p2150_p6), %s2017_s30, %s1765_s17 }
 0x500   : > { %s1766_s23 = sshll.u32 (%p2150_p6), %s1513_s18, 3 }
 0x501   : > { %s1515_s20 = scalar_lea.vmem (%p2150_p6), %s2709_s8, %s1766_s23 }
 0x503   : > { %v1546_v36 = vld [vmem:[%s2203_s3] sm:$0xff] }
 0x504   : > { %v1548_v6 = vld [vmem:[%s2203_s3 + $0x8] sm:$0xff]  ;;  %1547 = vst [vmem:[%s1515_s20] sm:$0xff] %v1546_v36 }
 0x505   : > { %1549 = vst [vmem:[%s1515_s20 + $0x10] sm:$0xff] %v1548_v6 }
 0x506 PF: > { %s18_s13 = sadd.s32 1, %s2037_s13   ;;  %s2730_s27 = sld [smem:[#allocation8_spill]] }
 0x507   : > { %p15_p3 = scmp.ge.s32.totalorder %s18_s13, 10   ;;  %s2731_s28 = sld [smem:[#allocation15_spill]] }
 0x508   : > { %s2732_s29 = sld [smem:[#allocation9_spill]] }
 0x509   : > { %s2733_s30 = sld [smem:[#allocation10_spill]]  ;;  %17 = sbr.rel (!%p15_p3) target bundleno = 8 (0x8), region = 188 }
 0x50a   : > { %s2734_s9 = sld [smem:[#allocation11_spill]] }
 0x50b   : > { %s2735_s10 = sld [smem:[#allocation12_spill]] }
 0x50c   : > { %s2736_s11 = sld [smem:[#allocation13_spill]] }
 0x50d   : > { %s2737_s12 = sld [smem:[#allocation14_spill]] }

</bundles_post_ra>
